<compile_context>
chip_gen: v7x
topology: tpu7x:2x2x1
jax: 0.10.0
libtpu: 0.0.40
codegen_flags: <defaults>
</compile_context>

<pallas_src>
import functools

import numpy as np
import jax
import jax.numpy as jnp
from jax.experimental import pallas as pl
from jax.experimental.pallas import tpu as pltpu

_BN_EPS = 1e-5
_VMEM_MM = 32 * 1024 * 1024
_VMEM_CONV = 40 * 1024 * 1024


# ----------------------------------------------------------------------------
# tiling helpers
# ----------------------------------------------------------------------------
def _row_tile(m, cap=1024):
    """Largest nice row tile dividing m (prefers ~1024 rows)."""
    for t in (1024, 512, 256, 128, 64, 32, 16, 8):
        if t <= m and m % t == 0:
            return t
    # fallback: largest multiple-of-8 divisor (keeps (8,128) blocks + pipelining)
    for t in range((min(m, cap) // 8) * 8, 0, -8):
        if m % t == 0:
            return t
    return m


def _h_tile(h, w):
    """Output-row tile for the 3x3 conv so th*w ~ 512 rows per matmul."""
    th = min(h, max(1, 512 // w))
    while h % th:
        th -= 1
    return th


# ----------------------------------------------------------------------------
# Pallas kernels
# ----------------------------------------------------------------------------
def _mm_bn_act_kernel(x_ref, w_ref, scale_ref, shift_ref, o_ref, *, act):
    """o = act((x @ w) * scale + shift); bf16 MXU inputs, f32 accumulate."""
    y = jnp.dot(x_ref[...], w_ref[...], preferred_element_type=jnp.float32)
    y = y * scale_ref[...] + shift_ref[...]
    if act == "relu":
        y = jnp.maximum(y, 0.0)
    elif act == "sigmoid":
        y = jax.nn.sigmoid(y)
    o_ref[...] = y.astype(o_ref.dtype)


def matmul_bn_act(x, w, scale, shift, act="none", out_dtype=jnp.bfloat16):
    """y = act((x @ w) * scale + shift); row(M)-tiled, weights resident."""
    m, k = x.shape
    k2, n_out = w.shape
    assert k == k2
    tm = _row_tile(m)
    scale2 = scale.reshape(1, n_out).astype(jnp.float32)
    shift2 = shift.reshape(1, n_out).astype(jnp.float32)
    return pl.pallas_call(
        functools.partial(_mm_bn_act_kernel, act=act),
        out_shape=jax.ShapeDtypeStruct((m, n_out), out_dtype),
        grid=(m // tm,),
        in_specs=[
            pl.BlockSpec((tm, k), lambda i: (i, 0)),
            pl.BlockSpec((k, n_out), lambda i: (0, 0)),
            pl.BlockSpec((1, n_out), lambda i: (0, 0)),
            pl.BlockSpec((1, n_out), lambda i: (0, 0)),
        ],
        out_specs=pl.BlockSpec((tm, n_out), lambda i: (i, 0)),
        compiler_params=pltpu.CompilerParams(
            dimension_semantics=("parallel",),
            vmem_limit_bytes=_VMEM_MM),
    )(x.astype(jnp.bfloat16), w.astype(jnp.bfloat16), scale2, shift2)


def _conv3x3_kernel(x_ref, w_ref, scale_ref, shift_ref, o_ref, *rest,
                    th, W, inv_hw):
    """3x3 / pad=1 / stride=1 conv on an NHWC row-tile.

    The padded image stays resident; the 9 taps are concatenated along the
    lane axis into a single (th*W, 9*C) LHS so ONE MXU dot accumulates over
    all taps internally (no f32 accumulator spills).  Optionally also
    accumulates a global-average-pool of the post-ReLU output (`rest[0]`).
    """
    r0 = pl.program_id(1) * th
    taps = []
    for kh in range(3):
        for kw in range(3):
            taps.append(x_ref[pl.ds(r0 + kh, th), pl.ds(kw, W), :])
    xs = jnp.concatenate(taps, axis=-1).reshape(th * W, -1)      # (th*W, 9*C)
    y = jnp.dot(xs, w_ref[...], preferred_element_type=jnp.float32)
    y = jnp.maximum(y * scale_ref[...] + shift_ref[...], 0.0)
    o_ref[...] = y.astype(o_ref.dtype)

    if rest:                                                     # fused GAP
        gap_ref = rest[0]

        @pl.when(pl.program_id(1) == 0)
        def _():
            gap_ref[...] = jnp.zeros_like(gap_ref)

        gap_ref[...] += jnp.sum(y, axis=0, keepdims=True)

        @pl.when(pl.program_id(1) == pl.num_programs(1) - 1)
        def _():
            gap_ref[...] = gap_ref[...] * inv_hw


def conv3x3_bn_relu_nhwc(x_nhwc, w_oihw, b, bn, with_gap=False):
    """conv_bn_relu (3x3, pad 1) on NHWC -> (N, H*W, O) bf16 [, (N, O) f32 GAP]."""
    n, h, w, c = x_nhwc.shape
    o = w_oihw.shape[0]
    x_pad = jnp.pad(x_nhwc.astype(jnp.bfloat16), ((0, 0), (1, 1), (1, 1), (0, 0)))
    # (O,C,3,3) -> (3,3,C,O) -> (9*C, O): stacked-K weight matching the tap order.
    wk = jnp.transpose(w_oihw, (2, 3, 1, 0)).reshape(9 * c, o).astype(jnp.bfloat16)
    scale, shift = fold_conv_bias_bn(b, bn)
    th = _h_tile(h, w)

    out_shapes = [jax.ShapeDtypeStruct((n, h * w, o), jnp.bfloat16)]
    out_specs = [pl.BlockSpec((None, th * w, o), lambda ni, i: (ni, i, 0))]
    if with_gap:
        out_shapes.append(jax.ShapeDtypeStruct((n, 1, o), jnp.float32))
        out_specs.append(pl.BlockSpec((None, 1, o), lambda ni, i: (ni, 0, 0)))
        sem = ("parallel", "arbitrary")       # GAP output revisited along axis 1
    else:
        sem = ("parallel", "parallel")

    res = pl.pallas_call(
        functools.partial(_conv3x3_kernel, th=th, W=w, inv_hw=1.0 / (h * w)),
        out_shape=tuple(out_shapes) if with_gap else out_shapes[0],
        grid=(n, h // th),
        in_specs=[
            pl.BlockSpec((None, h + 2, w + 2, c), lambda ni, i: (ni, 0, 0, 0)),
            pl.BlockSpec((9 * c, o), lambda ni, i: (0, 0)),
            pl.BlockSpec((1, o), lambda ni, i: (0, 0)),
            pl.BlockSpec((1, o), lambda ni, i: (0, 0)),
        ],
        out_specs=tuple(out_specs) if with_gap else out_specs[0],
        compiler_params=pltpu.CompilerParams(
            dimension_semantics=sem, vmem_limit_bytes=_VMEM_CONV),
    )(x_pad, wk,
      scale.reshape(1, o).astype(jnp.float32),
      shift.reshape(1, o).astype(jnp.float32))

    if with_gap:
        f, gap = res
        return f, gap.reshape(n, o)
    return res


def _mlp2_kernel(x_ref, w1_ref, b1_ref, w2_ref, b2_ref, o_ref):
    """Fused Linear->ReLU->Linear(512->1)->Sigmoid; 2nd layer on the VPU."""
    h = jnp.dot(x_ref[...], w1_ref[...], preferred_element_type=jnp.float32)
    h = jnp.maximum(h + b1_ref[...], 0.0)
    g = jnp.sum(h * w2_ref[...], axis=-1, keepdims=True) + b2_ref[...]
    o_ref[...] = jax.nn.sigmoid(g).astype(o_ref.dtype)


def mlp2_sigmoid(x, w1, b1, w2, b2):
    """sigmoid(relu(x @ w1.T + b1) @ w2.T + b2); returns (M, 1) f32."""
    m, k = x.shape
    hdim = w1.shape[0]
    tm = _row_tile(m)
    return pl.pallas_call(
        _mlp2_kernel,
        out_shape=jax.ShapeDtypeStruct((m, 1), jnp.float32),
        grid=(m // tm,),
        in_specs=[
            pl.BlockSpec((tm, k), lambda i: (i, 0)),
            pl.BlockSpec((k, hdim), lambda i: (0, 0)),
            pl.BlockSpec((1, hdim), lambda i: (0, 0)),
            pl.BlockSpec((1, hdim), lambda i: (0, 0)),
            pl.BlockSpec((1, 1), lambda i: (0, 0)),
        ],
        out_specs=pl.BlockSpec((tm, 1), lambda i: (i, 0)),
        compiler_params=pltpu.CompilerParams(
            dimension_semantics=("parallel",), vmem_limit_bytes=_VMEM_MM),
    )(x.astype(jnp.bfloat16),
      w1.T.astype(jnp.bfloat16), b1.reshape(1, hdim).astype(jnp.float32),
      w2.reshape(1, hdim).astype(jnp.float32), b2.reshape(1, 1).astype(jnp.float32))


def _to_map_kernel(x_ref, w_ref, b_ref, o_ref):
    """cly tile = sigmoid(sum_c f * weff + b) — VPU multiply + lane reduce."""
    y = jnp.sum(x_ref[...].astype(jnp.float32) * w_ref[...], axis=-1, keepdims=True)
    o_ref[...] = jax.nn.sigmoid(y + b_ref[...]).astype(o_ref.dtype)


def to_map_gated(f_flat3, weff, bias):
    """cly = sigmoid(f @ (gate ⊙ w_1x1) + b) — slam gate fused into the 1x1."""
    nb, hw, c = f_flat3.shape
    tm = _row_tile(hw)
    b2 = jnp.asarray(bias, jnp.float32).reshape(1, 1)
    return pl.pallas_call(
        _to_map_kernel,
        out_shape=jax.ShapeDtypeStruct((nb, hw, 1), jnp.float32),
        grid=(nb, hw // tm),
        in_specs=[
            pl.BlockSpec((None, tm, c), lambda n, i: (n, i, 0)),
            pl.BlockSpec((None, 1, c), lambda n, i: (n, 0, 0)),
            pl.BlockSpec((1, 1), lambda n, i: (0, 0)),
        ],
        out_specs=pl.BlockSpec((None, tm, 1), lambda n, i: (n, i, 0)),
        compiler_params=pltpu.CompilerParams(
            dimension_semantics=("parallel", "parallel"),
            vmem_limit_bytes=_VMEM_MM),
    )(f_flat3, weff, b2)


# ----------------------------------------------------------------------------
# Plain-JAX glue: bilinear (align_corners=True) resize matrices, BN folding
# ----------------------------------------------------------------------------
def bilinear_matrix(src, dst):
    """PyTorch bilinear / align_corners=True interpolation matrix (dst, src)."""
    A = np.zeros((dst, src), dtype=np.float32)
    for i in range(dst):
        coord = 0.0 if dst == 1 else i * (src - 1) / (dst - 1)
        i0 = min(int(np.floor(coord)), src - 1)
        i1 = min(i0 + 1, src - 1)
        frac = coord - i0
        A[i, i0] += 1.0 - frac
        A[i, i1] += frac
    return jnp.asarray(A)


def bn_default(c):
    """PyTorch BatchNorm2d default init / fresh running stats."""
    return {"gamma": jnp.ones((c,), jnp.float32),
            "beta": jnp.zeros((c,), jnp.float32),
            "mean": jnp.zeros((c,), jnp.float32),
            "var": jnp.ones((c,), jnp.float32)}


def fold_conv_bias_bn(bias, bn):
    scale = bn["gamma"] / jnp.sqrt(bn["var"] + _BN_EPS)
    shift = bn["beta"] + scale * (bias - bn["mean"])
    return scale, shift


# ----------------------------------------------------------------------------
# ICNet head blocks
# ----------------------------------------------------------------------------
def slam_gate(feature_nhwc, p, spatial_dim=32):
    """slam(32) per-(n,c) sigmoid gate; the multiply is fused downstream."""
    n, h, w, c = feature_nhwc.shape
    f32 = feature_nhwc.astype(jnp.float32)
    if h != spatial_dim or w != spatial_dim:
        Ah = bilinear_matrix(h, spatial_dim)
        Aw = bilinear_matrix(w, spatial_dim)
        s = jnp.einsum("th,uw,nhwc->nctu", Ah, Aw, f32)
    else:
        s = jnp.transpose(f32, (0, 3, 1, 2))
    s = s.reshape(n * c, spatial_dim * spatial_dim)
    gate = mlp2_sigmoid(s, p["w1"], p["b1"], p["w2"], p["b2"])   # (n*c, 1)
    return gate.reshape(n, c)


# ----------------------------------------------------------------------------
# Frozen resnet50 encoder (plain-JAX glue, NHWC, deterministic weights)
# ----------------------------------------------------------------------------
def conv2d_nhwc(x, w_oihw, stride=1, padding=0):
    w = jnp.transpose(w_oihw, (2, 3, 1, 0))                      # HWIO
    return jax.lax.conv_general_dilated(
        x, w, window_strides=(stride, stride),
        padding=[(padding, padding), (padding, padding)],
        dimension_numbers=("NHWC", "HWIO", "NHWC"))


def bn_eval_default(x):
    # inference-mode BN with default params -> rescale by 1/sqrt(1+eps)
    return x * (1.0 / np.sqrt(1.0 + _BN_EPS))


def maxpool_3x3_s2_nhwc(x):
    return jax.lax.reduce_window(
        x, -jnp.inf, jax.lax.max,
        window_dimensions=(1, 3, 3, 1), window_strides=(1, 2, 2, 1),
        padding=((0, 0), (1, 1), (1, 1), (0, 0)))


def bottleneck(x, bp):
    out = jax.nn.relu(bn_eval_default(conv2d_nhwc(x, bp["c1"])))
    out = jax.nn.relu(bn_eval_default(
        conv2d_nhwc(out, bp["c2"], stride=bp["stride"], padding=1)))
    out = bn_eval_default(conv2d_nhwc(out, bp["c3"]))
    if "cd" in bp:
        identity = bn_eval_default(conv2d_nhwc(x, bp["cd"], stride=bp["stride"]))
    else:
        identity = x
    return jax.nn.relu(out + identity)


def resnet50_encoder_nhwc(x, ep):
    x = jax.nn.relu(bn_eval_default(conv2d_nhwc(x, ep["conv1"], stride=2,
                                                padding=3)))
    x = maxpool_3x3_s2_nhwc(x)
    for stage in ep["stages"]:
        for bp in stage:
            x = bottleneck(x, bp)
    return x                                       # (N, H/32, W/32, 2048)


# ----------------------------------------------------------------------------
# Deterministic parameter initialisation
# ----------------------------------------------------------------------------
def _conv_w(key, o, i, kh, kw):
    fan_in = i * kh * kw
    return jax.random.normal(key, (o, i, kh, kw), jnp.float32) * np.sqrt(2.0 / fan_in)


def _lin_w(key, o, i):
    return jax.random.normal(key, (o, i), jnp.float32) * np.sqrt(1.0 / i)


def _bias(key, o):
    return jax.random.normal(key, (o,), jnp.float32) * 0.01


def init_resnet50_params(key):
    keys = iter(jax.random.split(key, 64))
    ep = {"conv1": _conv_w(next(keys), 64, 3, 7, 7)}
    stages = []
    inplanes = 64
    for planes, blocks, stride in [(64, 3, 1), (128, 4, 2), (256, 6, 2), (512, 3, 2)]:
        stage = []
        for bi in range(blocks):
            s = stride if bi == 0 else 1
            bp = {"stride": s,
                  "c1": _conv_w(next(keys), planes, inplanes, 1, 1),
                  "c2": _conv_w(next(keys), planes, planes, 3, 3),
                  "c3": _conv_w(next(keys), planes * 4, planes, 1, 1)}
            if s != 1 or inplanes != planes * 4:
                bp["cd"] = _conv_w(next(keys), planes * 4, inplanes, 1, 1)
            inplanes = planes * 4
            stage.append(bp)
        stages.append(stage)
    ep["stages"] = stages
    return ep


def init_head_params(key):
    ks = iter(jax.random.split(key, 32))
    p = {}
    p["up"] = {"w": _conv_w(next(ks), 512, 2048, 1, 1),
               "b": _bias(next(ks), 512), "bn": bn_default(512)}
    p["to_map_f"] = {"w": _conv_w(next(ks), 512, 512, 3, 3),
                     "b": _bias(next(ks), 512), "bn": bn_default(512)}
    p["to_score_f"] = {"w": _conv_w(next(ks), 512, 512, 3, 3),
                       "b": _bias(next(ks), 512), "bn": bn_default(512)}
    p["to_map_f_slam"] = {"w1": _lin_w(next(ks), 512, 32 * 32), "b1": _bias(next(ks), 512),
                          "w2": _lin_w(next(ks), 1, 512), "b2": _bias(next(ks), 1)}
    p["to_score_f_slam"] = {"w1": _lin_w(next(ks), 512, 32 * 32), "b1": _bias(next(ks), 512),
                            "w2": _lin_w(next(ks), 1, 512), "b2": _bias(next(ks), 1)}
    p["to_map"] = {"w": _conv_w(next(ks), 1, 512, 1, 1), "b": _bias(next(ks), 1)}
    p["head"] = {"w1": _lin_w(next(ks), 512, 512), "b1": _bias(next(ks), 512),
                 "w2": _lin_w(next(ks), 1, 512), "b2": _bias(next(ks), 1)}
    return p


# ----------------------------------------------------------------------------
# Full ICNet_ft forward
# ----------------------------------------------------------------------------
def icnet_ft_forward(x_nchw, enc_params, head_params, size):
    hp = head_params
    upsize = size // 8

    # single layout change: NCHW -> NHWC, then NHWC everywhere.
    x = jnp.transpose(x_nchw, (0, 2, 3, 1))
    feat = resnet50_encoder_nhwc(x, enc_params)            # (N, s/32, s/32, 2048)
    n, fh, fw, cf = feat.shape

    # up_conv_bn_relu, commuted: 1x1 conv + BN on low-res features, then the
    # linear align_corners upsample, then ReLU (exact up to float reassociation
    # since the interpolation weights sum to 1 per output pixel).
    w_up = hp["up"]["w"].reshape(512, cf).T                # (cf, 512)
    up_scale, up_shift = fold_conv_bias_bn(hp["up"]["b"], hp["up"]["bn"])
    low = matmul_bn_act(feat.reshape(n * fh * fw, cf), w_up, up_scale, up_shift,
                        act="none")                        # (n*fh*fw, 512) bf16
    low = low.reshape(n, fh, fw, 512)
    Ah = bilinear_matrix(fh, upsize)
    Aw = bilinear_matrix(fw, upsize)
    up = jnp.einsum("th,uw,nhwc->ntuc", Ah, Aw, low.astype(jnp.float32))   # glue
    up_nhwc = jnp.maximum(up, 0.0).astype(jnp.bfloat16)    # (N, up, up, 512)

    # ---- map branch: to_map(to_map_f_slam(to_map_f(up))) ----
    f_map = conv3x3_bn_relu_nhwc(up_nhwc, hp["to_map_f"]["w"],
                                 hp["to_map_f"]["b"], hp["to_map_f"]["bn"])
    f_map_4d = f_map.reshape(n, upsize, upsize, 512)
    gate_map = slam_gate(f_map_4d, hp["to_map_f_slam"], spatial_dim=32)   # (N,512)
    w_map = hp["to_map"]["w"].reshape(1, 512)
    weff = (gate_map * w_map).astype(jnp.float32).reshape(n, 1, 512)
    cly_flat = to_map_gated(f_map, weff, hp["to_map"]["b"])               # (N,HW,1)
    cly_map = jnp.transpose(cly_flat.reshape(n, upsize, upsize, 1),
                            (0, 3, 1, 2))                                 # NCHW

    # ---- score branch (GAP fused into the conv3x3 kernel) ----
    f_sc, pool = conv3x3_bn_relu_nhwc(up_nhwc, hp["to_score_f"]["w"],
                                      hp["to_score_f"]["b"], hp["to_score_f"]["bn"],
                                      with_gap=True)                      # pool (N,512)
    f_sc_4d = f_sc.reshape(n, upsize, upsize, 512)
    gate_sc = slam_gate(f_sc_4d, hp["to_score_f_slam"], spatial_dim=32)   # (N,512)
    pooled = pool * gate_sc          # mean(gate*f) == gate*mean(f) per (n,c)
    score = mlp2_sigmoid(pooled, hp["head"]["w1"], hp["head"]["b1"],
                         hp["head"]["w2"], hp["head"]["b2"])              # (N,1)
    score = jnp.squeeze(score)
    return score, cly_map


# ----------------------------------------------------------------------------
if __name__ == "__main__":
    size = 64                                              # small stand-in for 512
    key = jax.random.PRNGKey(0)
    k_enc, k_head, k_x = jax.random.split(key, 3)

    enc_params = init_resnet50_params(k_enc)
    head_params = init_head_params(k_head)
    x = jax.random.normal(k_x, (2, 3, size, size), jnp.float32)

    score, cly_map = icnet_ft_forward(x, enc_params, head_params, size)
    jax.block_until_ready((score, cly_map))

    assert score.shape == (2,), score.shape
    assert cly_map.shape == (2, 1, size // 8, size // 8), cly_map.shape
    assert jnp.all(jnp.isfinite(score)) and jnp.all(jnp.isfinite(cly_map))
    print("KERNEL_OK")
</pallas_src>

<mosaic_0001>
module attributes {stable_mosaic.version = 11 : i64} {
  func.func @_mm_bn_act_kernel(%arg0: i32, %arg1: memref<8x2048xbf16, #tpu.memory_space<vmem>>, %arg2: memref<2048x512xbf16, #tpu.memory_space<vmem>>, %arg3: memref<1x512xf32, #tpu.memory_space<vmem>>, %arg4: memref<1x512xf32, #tpu.memory_space<vmem>>, %arg5: memref<8x512xbf16, #tpu.memory_space<vmem>>) attributes {dimension_semantics = [#tpu.dimension_semantics<parallel>], iteration_bounds = array<i64: 1>, scalar_prefetch = 0 : i64, scratch_operands = 0 : i64, tpu.core_type = #tpu.core_type<tc>, window_params = [{transform_indices = @transform_0, window_bounds = array<i64: 8, 2048>}, {pipeline_mode = #tpu.pipeline_mode<synchronous>, transform_indices = @transform_1, window_bounds = array<i64: 2048, 512>}, {pipeline_mode = #tpu.pipeline_mode<synchronous>, transform_indices = @transform_2, window_bounds = array<i64: 1, 512>}, {pipeline_mode = #tpu.pipeline_mode<synchronous>, transform_indices = @transform_3, window_bounds = array<i64: 1, 512>}, {transform_indices = @transform_4, window_bounds = array<i64: 8, 512>}]} {
    %c0 = arith.constant 0 : index
    %c0_0 = arith.constant 0 : index
    %0 = vector.load %arg1[%c0, %c0_0] : memref<8x2048xbf16, #tpu.memory_space<vmem>>, vector<8x2048xbf16>
    %c0_1 = arith.constant 0 : index
    %c0_2 = arith.constant 0 : index
    %1 = vector.load %arg2[%c0_1, %c0_2] : memref<2048x512xbf16, #tpu.memory_space<vmem>>, vector<2048x512xbf16>
    %cst = arith.constant dense<0.000000e+00> : vector<8x512xf32>
    %2 = tpu.matmul %0, %1, %cst {dimension_numbers = #tpu.dot_dimension_numbers<[1], [0], [0], [1], [0, 0, 1, 1], [], []>} : vector<8x2048xbf16>, vector<2048x512xbf16>, vector<8x512xf32> -> vector<8x512xf32>
    %c0_3 = arith.constant 0 : index
    %c0_4 = arith.constant 0 : index
    %3 = vector.load %arg3[%c0_3, %c0_4] : memref<1x512xf32, #tpu.memory_space<vmem>>, vector<1x512xf32>
    %4 = vector.broadcast %3 : vector<1x512xf32> to vector<8x512xf32>
    %5 = arith.mulf %2, %4 : vector<8x512xf32>
    %c0_5 = arith.constant 0 : index
    %c0_6 = arith.constant 0 : index
    %6 = vector.load %arg4[%c0_5, %c0_6] : memref<1x512xf32, #tpu.memory_space<vmem>>, vector<1x512xf32>
    %7 = vector.broadcast %6 : vector<1x512xf32> to vector<8x512xf32>
    %8 = arith.addf %5, %7 : vector<8x512xf32>
    %9 = arith.truncf %8 : vector<8x512xf32> to vector<8x512xbf16>
    %c0_7 = arith.constant 0 : index
    %c0_8 = arith.constant 0 : index
    %10 = vector.load %arg5[%c0_7, %c0_8] : memref<8x512xbf16, #tpu.memory_space<vmem>>, vector<8x512xbf16>
    tpu.vector_store %arg5[%c0_7, %c0_8], %9 {strides = array<i32>} : memref<8x512xbf16, #tpu.memory_space<vmem>>, vector<8x512xbf16>,
    return
  }
  func.func @transform_0(%arg0: i32) -> (i32, i32) {
    %c0_i32 = arith.constant 0 : i32
    %c0_i32_0 = arith.constant 0 : i32
    return %arg0, %c0_i32 : i32, i32
  }
  func.func @transform_1(%arg0: i32) -> (i32, i32) {
    %c0_i32 = arith.constant 0 : i32
    %c0_i32_0 = arith.constant 0 : i32
    %c0_i32_1 = arith.constant 0 : i32
    return %c0_i32, %c0_i32_0 : i32, i32
  }
  func.func @transform_2(%arg0: i32) -> (i32, i32) {
    %c0_i32 = arith.constant 0 : i32
    %c0_i32_0 = arith.constant 0 : i32
    %c0_i32_1 = arith.constant 0 : i32
    return %c0_i32, %c0_i32_0 : i32, i32
  }
  func.func @transform_3(%arg0: i32) -> (i32, i32) {
    %c0_i32 = arith.constant 0 : i32
    %c0_i32_0 = arith.constant 0 : i32
    %c0_i32_1 = arith.constant 0 : i32
    return %c0_i32, %c0_i32_0 : i32, i32
  }
  func.func @transform_4(%arg0: i32) -> (i32, i32) {
    %c0_i32 = arith.constant 0 : i32
    %c0_i32_0 = arith.constant 0 : i32
    return %arg0, %c0_i32 : i32, i32
  }
}

</mosaic_0001>

<bundles_post_ra>
// kernel: tpu_custom_call.1
= control target key start
LH: loop header
LB: loop body
LE: loop exit
PB: predicated region body
PF: predicated region fallthrough
CT: control target
= control target key end

     0   :  { %9 = vsyncpa [#allocation3], 0  ;;  %s5577_s0 = inlined_call_operand.hbm [shape: bf16[8,2048], index: 0, kind: input, shape index: {}]   ;;  %s5578_s1 = inlined_call_operand.hbm [shape: bf16[2048,512], index: 1, kind: input, shape index: {}]   ;;  %s5579_s2 = inlined_call_operand.hbm [shape: f32[1,512], index: 2, kind: input, shape index: {}]   ;;  %s5580_s3 = inlined_call_operand.hbm [shape: f32[1,512], index: 3, kind: input, shape index: {}]   ;;  %s5581_s4 = inlined_call_operand.hbm [shape: bf16[8,512], index: 4, kind: output, shape index: {}]  }
   0x1   :  { %10 = vsyncpa [#allocation6], 0 }
   0x2   :  { %11 = vsyncpa [#allocation9], 0 }
   0x3   :  { %12 = vsyncpa [#allocation4], 0  ;;  %s5443_s15 = smov [#allocation5]   ;;  %s5325_s19 = scalar_lea.hbm %s5578_s1, 65536 }
   0x4   :  { %s28_s16 = sshll.u32 %s5443_s15, 4  ;;  %p5326_p0 = scmp.ne.s32.totalorder %s5578_s1, %s5325_s19  ;;  %s29_s16 = int_to_ptr.vmem [resolvable:$true] %s28_s16 }
   0x5   :  { %p5329_p1 = scmp.lt.u32.totalorder %s5325_s19, %s5578_s1 }
   0x7   :  { %p5331_p2 = pnand %p5329_p1, %p5326_p0 }
   0x9   :  { %5334 = shalt.err (!%p5331_p2)
}
   0xa   :  { %s5335_s24 = scalar_lea.vmem %s29_s16, 65536  ;;  %p5340_p4 = scmp.lt.s32.totalorder %s29_s16, %s29_s16 }
   0xb   :  { %p5336_p3 = scmp.ne.s32.totalorder %s29_s16, %s5335_s24  ;;  %p5341_p5 = scmp.lt.s32.totalorder %s5335_s24, %s5335_s24 }
   0xd   :  { %p5342_p6 = por %p5341_p5, %p5340_p4 }
   0xf   :  { %p5343_p7 = pnand %p5342_p6, %p5336_p3 }
  0x11   :  { %5346 = shalt.err (!%p5343_p7)
}
  0x12   :  { %s5444_s25 = smov 256   ;;  %s5445_s26 = smov 16  }
  0x13   :  { %34 = dma.hbm_to_vmem [thread:$0]  %s5578_s1, 65536, %s29_s16, [#allocation6], %s5444_s25, %s5444_s25, %s5445_s26  }
  0x14   :  { %s5446_s29 = smov [#allocation2]   ;;  %s5447_s5 = smov [#allocation7]  }
  0x15   :  { %s19_s30 = sshll.u32 %s5446_s29, 4  ;;  %s41_s6 = sshll.u32 %s5447_s5, 4  ;;  %s20_s30 = int_to_ptr.vmem [resolvable:$true] %s19_s30  ;;  %s42_s6 = int_to_ptr.vmem [resolvable:$true] %s41_s6 }
  0x16   :  { %s5347_s9 = scalar_lea.hbm %s5577_s0, 1024 }
  0x17   :  { %p5348_p8 = scmp.ne.s32.totalorder %s5577_s0, %s5347_s9  ;;  %p5351_p9 = scmp.lt.u32.totalorder %s5347_s9, %s5577_s0 }
  0x19   :  { %p5353_p10 = pnand %p5351_p9, %p5348_p8 }
  0x1b   :  { %5356 = shalt.err (!%p5353_p10)
}
  0x1c   :  { %s5357_s1 = scalar_lea.vmem %s20_s30, 1024  ;;  %p5362_p12 = scmp.lt.s32.totalorder %s20_s30, %s20_s30 }
  0x1d   :  { %p5358_p11 = scmp.ne.s32.totalorder %s20_s30, %s5357_s1  ;;  %p5363_p13 = scmp.lt.s32.totalorder %s5357_s1, %s5357_s1 }
  0x1f   :  { %p5364_p0 = por %p5363_p13, %p5362_p12 }
  0x21   :  { %p5365_p1 = pnand %p5364_p0, %p5358_p11 }
  0x23   :  { %5368 = shalt.err (!%p5365_p1)
}
  0x24   :  { %22 = dma.hbm_to_vmem [thread:$0]  %s5577_s0, 1024, %s20_s30, [#allocation3]  }
  0x25   :  { %s5369_s18 = scalar_lea.hbm %s5579_s2, 64 }
  0x26   :  { %p5370_p2 = scmp.ne.s32.totalorder %s5579_s2, %s5369_s18  ;;  %p5373_p3 = scmp.lt.u32.totalorder %s5369_s18, %s5579_s2 }
  0x28   :  { %p5375_p4 = pnand %p5373_p3, %p5370_p2 }
  0x2a   :  { %5378 = shalt.err (!%p5375_p4)
}
  0x2b   :  { %s5379_s23 = scalar_lea.vmem %s42_s6, 64  ;;  %p5384_p6 = scmp.lt.s32.totalorder %s42_s6, %s42_s6 }
  0x2c   :  { %p5380_p5 = scmp.ne.s32.totalorder %s42_s6, %s5379_s23  ;;  %p5385_p7 = scmp.lt.s32.totalorder %s5379_s23, %s5379_s23 }
  0x2e   :  { %p5386_p8 = por %p5385_p7, %p5384_p6 }
  0x30   :  { %p5387_p9 = pnand %p5386_p8, %p5380_p5 }
  0x32   :  { %5390 = shalt.err (!%p5387_p9)
}
  0x33   :  { %44 = dma.hbm_to_vmem [thread:$0]  %s5579_s2, 64, %s42_s6, [#allocation6]  }
  0x34   :  { %s5448_s25 = smov [#allocation8]   ;;  %s5391_s29 = scalar_lea.hbm %s5580_s3, 64 }
  0x35   :  { %s51_s26 = sshll.u32 %s5448_s25, 4  ;;  %p5392_p10 = scmp.ne.s32.totalorder %s5580_s3, %s5391_s29  ;;  %s52_s26 = int_to_ptr.vmem [resolvable:$true] %s51_s26 }
  0x36   :  { %p5395_p11 = scmp.lt.u32.totalorder %s5391_s29, %s5580_s3 }
  0x38   :  { %p5397_p12 = pnand %p5395_p11, %p5392_p10 }
  0x3a   :  { %5400 = shalt.err (!%p5397_p12)
}
  0x3b   :  { %s5401_s9 = scalar_lea.vmem %s52_s26, 64  ;;  %p5406_p0 = scmp.lt.s32.totalorder %s52_s26, %s52_s26 }
  0x3c   :  { %p5402_p13 = scmp.ne.s32.totalorder %s52_s26, %s5401_s9  ;;  %p5407_p1 = scmp.lt.s32.totalorder %s5401_s9, %s5401_s9 }
  0x3e   :  { %p5408_p2 = por %p5407_p1, %p5406_p0 }
  0x40   :  { %p5409_p3 = pnand %p5408_p2, %p5402_p13 }
  0x42   :  { %5412 = shalt.err (!%p5409_p3)
}
  0x43   :  { %54 = dma.hbm_to_vmem [thread:$0]  %s5580_s3, 64, %s52_s26, [#allocation9]  }
  0x44   :  { %5435 = dma.done.wait [#allocation3], 1024  }
  0x45   :  { %5436 = vsyncadd [#allocation3], 4294966272 }
  0x46   :  { %5437 = dma.done.wait [#allocation6], 65600  }
  0x47   :  { %5438 = vsyncadd [#allocation6], 4294901696 }
  0x48   :  { %5439 = dma.done.wait [#allocation9], 64  }
  0x49   :  { %5440 = vsyncadd [#allocation9], 4294967232  ;;  %v4541_v0 = vld [vmem:[#allocation5 + $0x4] ss:$16 sps:$4 sm:$0xff]   ;;  %v4543_v1 = vld [vmem:[#allocation5 + $0xc] ss:$16 sps:$4 sm:$0xff]  }
  0x4a   :  { %3203 = vmatprep.subr.bf16.mxu0 %v4541_v0  ;;  %v4545_v2 = vld [vmem:[#allocation5] ss:$16 sps:$4 sm:$0xff]   ;;  %v4546_v3 = vld [vmem:[#allocation5 + $0x8] ss:$16 sps:$4 sm:$0xff]   ;;  %3531 = vmatprep.subr.bf16.mxu1 %v4543_v1  ;;  %v4547_v4 = vld [vmem:[#allocation5 + $0x24] ss:$16 sps:$4 sm:$0xff]  }
  0x4b   :  { %3204 = vmatpush1.bf16.msra.mxu0 %v4545_v2  ;;  %3532 = vmatpush1.bf16.msra.mxu1 %v4546_v3  ;;  %v4549_v5 = vld [vmem:[#allocation5 + $0x2c] ss:$16 sps:$4 sm:$0xff]   ;;  %v4551_v6 = vld [vmem:[#allocation5 + $0x20] ss:$16 sps:$4 sm:$0xff]   ;;  %v4552_v7 = vld [vmem:[#allocation5 + $0x28] ss:$16 sps:$4 sm:$0xff]  }
  0x4c   :  { %3205 = vmatprep.subr.bf16.mxu0 %v4547_v4  ;;  %3533 = vmatprep.subr.bf16.mxu1 %v4549_v5  ;;  %v4553_v8 = vld [vmem:[#allocation5 + $0x44] ss:$16 sps:$4 sm:$0xff]   ;;  %v4555_v9 = vld [vmem:[#allocation5 + $0x4c] ss:$16 sps:$4 sm:$0xff]   ;;  %v4557_v10 = vld [vmem:[#allocation5 + $0x40] ss:$16 sps:$4 sm:$0xff]  }
  0x4d   :  { %v4558_v11 = vld [vmem:[#allocation5 + $0x48] ss:$16 sps:$4 sm:$0xff]   ;;  %v4559_v12 = vld [vmem:[#allocation5 + $0x64] ss:$16 sps:$4 sm:$0xff]   ;;  %v4561_v13 = vld [vmem:[#allocation5 + $0x6c] ss:$16 sps:$4 sm:$0xff]  }
  0x4e   :  { %v4563_v14 = vld [vmem:[#allocation5 + $0x60] ss:$16 sps:$4 sm:$0xff]   ;;  %v4564_v15 = vld [vmem:[#allocation5 + $0x68] ss:$16 sps:$4 sm:$0xff]   ;;  %v4565_v16 = vld [vmem:[#allocation5 + $0x84] ss:$16 sps:$4 sm:$0xff]  }
  0x4f   :  { %3206 = vmatpush1.bf16.msra.mxu0 %v4551_v6  ;;  %3534 = vmatpush1.bf16.msra.mxu1 %v4552_v7  ;;  %v4567_v17 = vld [vmem:[#allocation5 + $0x8c] ss:$16 sps:$4 sm:$0xff]   ;;  %v4569_v18 = vld [vmem:[#allocation5 + $0x80] ss:$16 sps:$4 sm:$0xff]   ;;  %v4570_v19 = vld [vmem:[#allocation5 + $0x88] ss:$16 sps:$4 sm:$0xff]  }
  0x50   :  { %3207 = vmatprep.subr.bf16.mxu0 %v4553_v8  ;;  %3535 = vmatprep.subr.bf16.mxu1 %v4555_v9  ;;  %v4571_v20 = vld [vmem:[#allocation5 + $0xa4] ss:$16 sps:$4 sm:$0xff]   ;;  %v4573_v21 = vld [vmem:[#allocation5 + $0xac] ss:$16 sps:$4 sm:$0xff]   ;;  %v4575_v22 = vld [vmem:[#allocation5 + $0xa0] ss:$16 sps:$4 sm:$0xff]  }
  0x51   :  { %v4576_v23 = vld [vmem:[#allocation5 + $0xa8] ss:$16 sps:$4 sm:$0xff]   ;;  %v4577_v24 = vld [vmem:[#allocation5 + $0xc4] ss:$16 sps:$4 sm:$0xff]   ;;  %v4579_v25 = vld [vmem:[#allocation5 + $0xcc] ss:$16 sps:$4 sm:$0xff]  }
  0x52   :  { %v4581_v26 = vld [vmem:[#allocation5 + $0xc0] ss:$16 sps:$4 sm:$0xff]   ;;  %v4582_v27 = vld [vmem:[#allocation5 + $0xc8] ss:$16 sps:$4 sm:$0xff]   ;;  %v4583_v28 = vld [vmem:[#allocation5 + $0xe4] ss:$16 sps:$4 sm:$0xff]  }
  0x53   :  { %3208 = vmatpush1.bf16.msra.mxu0 %v4557_v10  ;;  %3536 = vmatpush1.bf16.msra.mxu1 %v4558_v11  ;;  %v4585_v29 = vld [vmem:[#allocation5 + $0xec] ss:$16 sps:$4 sm:$0xff]   ;;  %v4587_v30 = vld [vmem:[#allocation5 + $0xe0] ss:$16 sps:$4 sm:$0xff]   ;;  %v4588_v31 = vld [vmem:[#allocation5 + $0xe8] ss:$16 sps:$4 sm:$0xff]  }
  0x54   :  { %3209 = vmatprep.subr.bf16.mxu0 %v4559_v12  ;;  %3537 = vmatprep.subr.bf16.mxu1 %v4561_v13  ;;  %v4589_v32 = vld [vmem:[#allocation5 + $0x104] ss:$16 sps:$4 sm:$0xff]   ;;  %v4591_v33 = vld [vmem:[#allocation5 + $0x10c] ss:$16 sps:$4 sm:$0xff]   ;;  %v4593_v34 = vld [vmem:[#allocation5 + $0x100] ss:$16 sps:$4 sm:$0xff]  }
  0x55   :  { %v4594_v35 = vld [vmem:[#allocation5 + $0x108] ss:$16 sps:$4 sm:$0xff]   ;;  %v4595_v36 = vld [vmem:[#allocation5 + $0x124] ss:$16 sps:$4 sm:$0xff]   ;;  %v4597_v37 = vld [vmem:[#allocation5 + $0x12c] ss:$16 sps:$4 sm:$0xff]  }
  0x56   :  { %v4599_v38 = vld [vmem:[#allocation5 + $0x120] ss:$16 sps:$4 sm:$0xff]   ;;  %v4600_v39 = vld [vmem:[#allocation5 + $0x128] ss:$16 sps:$4 sm:$0xff]   ;;  %v4601_v40 = vld [vmem:[#allocation5 + $0x144] ss:$16 sps:$4 sm:$0xff]  }
  0x57   :  { %3210 = vmatpush1.bf16.msra.mxu0 %v4563_v14  ;;  %3538 = vmatpush1.bf16.msra.mxu1 %v4564_v15  ;;  %v4603_v41 = vld [vmem:[#allocation5 + $0x14c] ss:$16 sps:$4 sm:$0xff]   ;;  %v4605_v42 = vld [vmem:[#allocation5 + $0x140] ss:$16 sps:$4 sm:$0xff]   ;;  %v4606_v43 = vld [vmem:[#allocation5 + $0x148] ss:$16 sps:$4 sm:$0xff]  }
  0x58   :  { %3211 = vmatprep.subr.bf16.mxu0 %v4565_v16  ;;  %3539 = vmatprep.subr.bf16.mxu1 %v4567_v17  ;;  %v4607_v44 = vld [vmem:[#allocation5 + $0x164] ss:$16 sps:$4 sm:$0xff]   ;;  %v4609_v45 = vld [vmem:[#allocation5 + $0x16c] ss:$16 sps:$4 sm:$0xff]   ;;  %v4611_v47 = vld [vmem:[#allocation5 + $0x160] ss:$16 sps:$4 sm:$0xff]  }
  0x59   :  { %v67_v46 = vld [vmem:[#allocation2] sm:$0xff]  ;;  %v4612_v49 = vld [vmem:[#allocation5 + $0x168] ss:$16 sps:$4 sm:$0xff]   ;;  %v4615_v51 = vld [vmem:[#allocation5 + $0x18c] ss:$16 sps:$4 sm:$0xff]   ;;  %s5449_s3 = smov [#allocation10]  }
  0x5a   :  { %v3947_v48 = vcombine.high %v67_v46, %v67_v46  ;;  %v4613_v50 = vld [vmem:[#allocation5 + $0x184] ss:$16 sps:$4 sm:$0xff]   ;;  %v4617_v52 = vld [vmem:[#allocation5 + $0x180] ss:$16 sps:$4 sm:$0xff]   ;;  %v4618_v53 = vld [vmem:[#allocation5 + $0x188] ss:$16 sps:$4 sm:$0xff]   ;;  %v3946_v4 = vcombine.low %v67_v46, %v67_v46 }
  0x5b   :  { %3212 = vmatpush1.bf16.msra.mxu0 %v4569_v18  ;;  %3540 = vmatpush1.bf16.msra.mxu1 %v4570_v19  ;;  %v4619_v54 = vld [vmem:[#allocation5 + $0x1a4] ss:$16 sps:$4 sm:$0xff]   ;;  %v4621_v55 = vld [vmem:[#allocation5 + $0x1ac] ss:$16 sps:$4 sm:$0xff]   ;;  %v4623_v56 = vld [vmem:[#allocation5 + $0x1a0] ss:$16 sps:$4 sm:$0xff]  }
  0x5c   :  { %3213 = vmatprep.subr.bf16.mxu0 %v4571_v20  ;;  %3541 = vmatprep.subr.bf16.mxu1 %v4573_v21  ;;  %v4624_v57 = vld [vmem:[#allocation5 + $0x1a8] ss:$16 sps:$4 sm:$0xff]   ;;  %v4625_v58 = vld [vmem:[#allocation5 + $0x1c4] ss:$16 sps:$4 sm:$0xff]   ;;  %v4627_v59 = vld [vmem:[#allocation5 + $0x1cc] ss:$16 sps:$4 sm:$0xff]  }
  0x5d   :  { %3235 = vmatprep.mubr.bf16.mxu0 %v3947_v48  ;;  %3563 = vmatprep.mubr.bf16.mxu1 %v3947_v48  ;;  %v4629_v60 = vld [vmem:[#allocation5 + $0x1c0] ss:$16 sps:$4 sm:$0xff]   ;;  %v4630_v61 = vld [vmem:[#allocation5 + $0x1c8] ss:$16 sps:$4 sm:$0xff]   ;;  %v4631_v62 = vld [vmem:[#allocation5 + $0x1e4] ss:$16 sps:$4 sm:$0xff]  }
  0x5e   :  { %v4633_v63 = vld [vmem:[#allocation5 + $0x1ec] ss:$16 sps:$4 sm:$0xff]   ;;  %v4635_v0 = vld [vmem:[#allocation5 + $0x1e0] ss:$16 sps:$4 sm:$0xff]   ;;  %v4636_v1 = vld [vmem:[#allocation5 + $0x1e8] ss:$16 sps:$4 sm:$0xff]  }
  0x5f   :  { %3214 = vmatpush1.bf16.msra.mxu0 %v4575_v22  ;;  %3542 = vmatpush1.bf16.msra.mxu1 %v4576_v23  ;;  %v4641_v2 = vld [vmem:[#allocation5 + $0x204] ss:$16 sps:$4 sm:$0xff]   ;;  %v4644_v3 = vld [vmem:[#allocation5 + $0x20c] ss:$16 sps:$4 sm:$0xff]   ;;  %v4639_v5 = vld [vmem:[#allocation5 + $0x200] ss:$16 sps:$4 sm:$0xff]  }
  0x60   :  { %3215 = vmatprep.subr.bf16.mxu0 %v4577_v24  ;;  %3543 = vmatprep.subr.bf16.mxu1 %v4579_v25  ;;  %v4642_v6 = vld [vmem:[#allocation5 + $0x208] ss:$16 sps:$4 sm:$0xff]   ;;  %v4647_v7 = vld [vmem:[#allocation5 + $0x224] ss:$16 sps:$4 sm:$0xff]   ;;  %v4650_v8 = vld [vmem:[#allocation5 + $0x22c] ss:$16 sps:$4 sm:$0xff]  }
  0x61   :  { %v4645_v9 = vld [vmem:[#allocation5 + $0x220] ss:$16 sps:$4 sm:$0xff]   ;;  %v4648_v10 = vld [vmem:[#allocation5 + $0x228] ss:$16 sps:$4 sm:$0xff]   ;;  %v4653_v11 = vld [vmem:[#allocation5 + $0x244] ss:$16 sps:$4 sm:$0xff]  }
  0x62   :  { %v4656_v12 = vld [vmem:[#allocation5 + $0x24c] ss:$16 sps:$4 sm:$0xff]   ;;  %v4651_v13 = vld [vmem:[#allocation5 + $0x240] ss:$16 sps:$4 sm:$0xff]   ;;  %v4654_v14 = vld [vmem:[#allocation5 + $0x248] ss:$16 sps:$4 sm:$0xff]  }
  0x63   :  { %3216 = vmatpush1.bf16.msra.mxu0 %v4581_v26  ;;  %3544 = vmatpush1.bf16.msra.mxu1 %v4582_v27  ;;  %v4659_v15 = vld [vmem:[#allocation5 + $0x264] ss:$16 sps:$4 sm:$0xff]   ;;  %v4662_v16 = vld [vmem:[#allocation5 + $0x26c] ss:$16 sps:$4 sm:$0xff]   ;;  %v4657_v17 = vld [vmem:[#allocation5 + $0x260] ss:$16 sps:$4 sm:$0xff]  }
  0x64   :  { %3217 = vmatprep.subr.bf16.mxu0 %v4583_v28  ;;  %3545 = vmatprep.subr.bf16.mxu1 %v4585_v29  ;;  %v4660_v18 = vld [vmem:[#allocation5 + $0x268] ss:$16 sps:$4 sm:$0xff]   ;;  %v4665_v19 = vld [vmem:[#allocation5 + $0x284] ss:$16 sps:$4 sm:$0xff]   ;;  %v4668_v20 = vld [vmem:[#allocation5 + $0x28c] ss:$16 sps:$4 sm:$0xff]  }
  0x65   :  { %v4663_v21 = vld [vmem:[#allocation5 + $0x280] ss:$16 sps:$4 sm:$0xff]   ;;  %v4666_v22 = vld [vmem:[#allocation5 + $0x288] ss:$16 sps:$4 sm:$0xff]   ;;  %v4671_v23 = vld [vmem:[#allocation5 + $0x2a4] ss:$16 sps:$4 sm:$0xff]  }
  0x66   :  { %v4674_v24 = vld [vmem:[#allocation5 + $0x2ac] ss:$16 sps:$4 sm:$0xff]   ;;  %v4669_v25 = vld [vmem:[#allocation5 + $0x2a0] ss:$16 sps:$4 sm:$0xff]   ;;  %v4672_v26 = vld [vmem:[#allocation5 + $0x2a8] ss:$16 sps:$4 sm:$0xff]  }
  0x67   :  { %3218 = vmatpush1.bf16.msra.mxu0 %v4587_v30  ;;  %3546 = vmatpush1.bf16.msra.mxu1 %v4588_v31  ;;  %v4677_v27 = vld [vmem:[#allocation5 + $0x2c4] ss:$16 sps:$4 sm:$0xff]   ;;  %v4680_v28 = vld [vmem:[#allocation5 + $0x2cc] ss:$16 sps:$4 sm:$0xff]   ;;  %v4675_v31 = vld [vmem:[#allocation5 + $0x2c0] ss:$16 sps:$4 sm:$0xff]  }
  0x68   :  { %3219 = vmatprep.subr.bf16.mxu0 %v4589_v32  ;;  %3547 = vmatprep.subr.bf16.mxu1 %v4591_v33  ;;  %v5523_v29 = vld [vmem:[#allocation2 + $0x8] sm:$0xff]  ;;  %v4683_v33 = vld [vmem:[#allocation5 + $0x2e4] ss:$16 sps:$4 sm:$0xff]   ;;  %s3935_s10 = sshll.u32 %s5449_s3, 4  ;;  %s3936_s10 = int_to_ptr.vmem [resolvable:$true] %s3935_s10 }
  0x69   :  { %v3949_v30 = vcombine.high %v5523_v29, %v5523_v29  ;;  %v4678_v32 = vld [vmem:[#allocation5 + $0x2c8] ss:$16 sps:$4 sm:$0xff]   ;;  %v4704_v46 = vld [vmem:[#allocation5 + $0x34c] ss:$16 sps:$4 sm:$0xff]   ;;  %s5413_s11 = scalar_lea.vmem %s3936_s10, 256  ;;  %p5418_p5 = scmp.lt.s32.totalorder %s3936_s10, %s3936_s10 }
  0x6a   :  { %v4702_v48 = vld [vmem:[#allocation5 + $0x348] ss:$16 sps:$4 sm:$0xff]   ;;  %p5414_p4 = scmp.ne.s32.totalorder %s3936_s10, %s5413_s11  ;;  %p5419_p6 = scmp.lt.s32.totalorder %s5413_s11, %s5413_s11 }
  0x6b   :  { %3220 = vmatpush1.bf16.msra.mxu0 %v4593_v34  ;;  %3548 = vmatpush1.bf16.msra.mxu1 %v4594_v35  ;;  %v4686_v34 = vld [vmem:[#allocation5 + $0x2ec] ss:$16 sps:$4 sm:$0xff]   ;;  %v4681_v35 = vld [vmem:[#allocation5 + $0x2e0] ss:$16 sps:$4 sm:$0xff]  }
  0x6c   :  { %3221 = vmatprep.subr.bf16.mxu0 %v4595_v36  ;;  %3549 = vmatprep.subr.bf16.mxu1 %v4597_v37  ;;  %v4684_v36 = vld [vmem:[#allocation5 + $0x2e8] ss:$16 sps:$4 sm:$0xff]   ;;  %v4689_v37 = vld [vmem:[#allocation5 + $0x304] ss:$16 sps:$4 sm:$0xff]   ;;  %p5420_p7 = por %p5419_p6, %p5418_p5 }
  0x6e   :  { %p5421_p8 = pnand %p5420_p7, %p5414_p4 }
  0x6f   :  { %3222 = vmatpush1.bf16.msra.mxu0 %v4599_v38  ;;  %3550 = vmatpush1.bf16.msra.mxu1 %v4600_v39  ;;  %v4692_v38 = vld [vmem:[#allocation5 + $0x30c] ss:$16 sps:$4 sm:$0xff]   ;;  %v4687_v39 = vld [vmem:[#allocation5 + $0x300] ss:$16 sps:$4 sm:$0xff]  }
  0x70   :  { %3223 = vmatprep.subr.bf16.mxu0 %v4601_v40  ;;  %3551 = vmatprep.subr.bf16.mxu1 %v4603_v41  ;;  %v4690_v40 = vld [vmem:[#allocation5 + $0x308] ss:$16 sps:$4 sm:$0xff]   ;;  %v4695_v41 = vld [vmem:[#allocation5 + $0x324] ss:$16 sps:$4 sm:$0xff]  }
  0x73   :  { %3224 = vmatpush1.bf16.msra.mxu0 %v4605_v42  ;;  %3552 = vmatpush1.bf16.msra.mxu1 %v4606_v43  ;;  %v4698_v42 = vld [vmem:[#allocation5 + $0x32c] ss:$16 sps:$4 sm:$0xff]   ;;  %v4693_v43 = vld [vmem:[#allocation5 + $0x320] ss:$16 sps:$4 sm:$0xff]  }
  0x74   :  { %3225 = vmatprep.subr.bf16.mxu0 %v4607_v44  ;;  %3553 = vmatprep.subr.bf16.mxu1 %v4609_v45  ;;  %v4696_v44 = vld [vmem:[#allocation5 + $0x328] ss:$16 sps:$4 sm:$0xff]   ;;  %v4701_v45 = vld [vmem:[#allocation5 + $0x344] ss:$16 sps:$4 sm:$0xff]  }
  0x77   :  { %3226 = vmatpush1.bf16.msra.mxu0 %v4611_v47  ;;  %3554 = vmatpush1.bf16.msra.mxu1 %v4612_v49  ;;  %v4699_v47 = vld [vmem:[#allocation5 + $0x340] ss:$16 sps:$4 sm:$0xff]   ;;  %v4707_v49 = vld [vmem:[#allocation5 + $0x364] ss:$16 sps:$4 sm:$0xff]  }
  0x78   :  { %3227 = vmatprep.subr.bf16.mxu0 %v4613_v50  ;;  %3555 = vmatprep.subr.bf16.mxu1 %v4615_v51  ;;  %v4710_v50 = vld [vmem:[#allocation5 + $0x36c] ss:$16 sps:$4 sm:$0xff]   ;;  %v4705_v51 = vld [vmem:[#allocation5 + $0x360] ss:$16 sps:$4 sm:$0xff]  }
  0x7b   :  { %3228 = vmatpush1.bf16.msra.mxu0 %v4617_v52  ;;  %3556 = vmatpush1.bf16.msra.mxu1 %v4618_v53  ;;  %v4708_v52 = vld [vmem:[#allocation5 + $0x368] ss:$16 sps:$4 sm:$0xff]   ;;  %v4713_v53 = vld [vmem:[#allocation5 + $0x384] ss:$16 sps:$4 sm:$0xff]  }
  0x7c   :  { %3229 = vmatprep.subr.bf16.mxu0 %v4619_v54  ;;  %3557 = vmatprep.subr.bf16.mxu1 %v4621_v55  ;;  %v4716_v54 = vld [vmem:[#allocation5 + $0x38c] ss:$16 sps:$4 sm:$0xff]   ;;  %v4711_v55 = vld [vmem:[#allocation5 + $0x380] ss:$16 sps:$4 sm:$0xff]  }
  0x7f   :  { %3230 = vmatpush1.bf16.msra.mxu0 %v4623_v56  ;;  %3558 = vmatpush1.bf16.msra.mxu1 %v4624_v57  ;;  %v4714_v56 = vld [vmem:[#allocation5 + $0x388] ss:$16 sps:$4 sm:$0xff]   ;;  %v4719_v57 = vld [vmem:[#allocation5 + $0x3a4] ss:$16 sps:$4 sm:$0xff]  }
  0x80   :  { %3231 = vmatprep.subr.bf16.mxu0 %v4625_v58  ;;  %3559 = vmatprep.subr.bf16.mxu1 %v4627_v59  ;;  %v4722_v58 = vld [vmem:[#allocation5 + $0x3ac] ss:$16 sps:$4 sm:$0xff]   ;;  %v4717_v59 = vld [vmem:[#allocation5 + $0x3a0] ss:$16 sps:$4 sm:$0xff]  }
  0x83   :  { %3232 = vmatpush1.bf16.msra.mxu0 %v4629_v60  ;;  %3560 = vmatpush1.bf16.msra.mxu1 %v4630_v61  ;;  %v4720_v60 = vld [vmem:[#allocation5 + $0x3a8] ss:$16 sps:$4 sm:$0xff]   ;;  %v4725_v61 = vld [vmem:[#allocation5 + $0x3c4] ss:$16 sps:$4 sm:$0xff]  }
  0x84   :  { %3233 = vmatprep.subr.bf16.mxu0 %v4631_v62  ;;  %3561 = vmatprep.subr.bf16.mxu1 %v4633_v63  ;;  %v4728_v62 = vld [vmem:[#allocation5 + $0x3cc] ss:$16 sps:$4 sm:$0xff]   ;;  %v4723_v63 = vld [vmem:[#allocation5 + $0x3c0] ss:$16 sps:$4 sm:$0xff]  }
  0x87   :  { %3234 = vmatpush1.bf16.msra.mxu0 %v4635_v0  ;;  %3562 = vmatpush1.bf16.msra.mxu1 %v4636_v1  ;;  %v4726_v0 = vld [vmem:[#allocation5 + $0x3c8] ss:$16 sps:$4 sm:$0xff]   ;;  %v4731_v1 = vld [vmem:[#allocation5 + $0x3e4] ss:$16 sps:$4 sm:$0xff]  }
  0x88   :  { %3244 = vmatprep.subr.bf16.mxu0 %v4641_v2  ;;  %3572 = vmatprep.subr.bf16.mxu1 %v4644_v3  ;;  %v4734_v2 = vld [vmem:[#allocation5 + $0x3ec] ss:$16 sps:$4 sm:$0xff]   ;;  %v4729_v3 = vld [vmem:[#allocation5 + $0x3e0] ss:$16 sps:$4 sm:$0xff]  }
  0x8a   :  { %3236 = vmatmul.mubr.bf16.vlgmr.msra.gmra.mrb[0].mxu0 %v3946_v4  ;;  %3564 = vmatmul.mubr.bf16.vlgmr.msra.gmra.mrb[0].mxu1 %v3946_v4  ;;  %v4732_v4 = vld [vmem:[#allocation5 + $0x3e8] ss:$16 sps:$4 sm:$0xff]  }
  0x8b   :  { %3245 = vmatpush1.bf16.msra.mxu0 %v4639_v5  ;;  %3573 = vmatpush1.bf16.msra.mxu1 %v4642_v6  ;;  %v4739_v5 = vld [vmem:[#allocation5 + $0x404] ss:$16 sps:$4 sm:$0xff]   ;;  %v4742_v6 = vld [vmem:[#allocation5 + $0x40c] ss:$16 sps:$4 sm:$0xff]  }
  0x8c   :  { %3246 = vmatprep.subr.bf16.mxu0 %v4647_v7  ;;  %3574 = vmatprep.subr.bf16.mxu1 %v4650_v8  ;;  %v3948_v7 = vcombine.low %v5523_v29, %v5523_v29  ;;  %v4737_v8 = vld [vmem:[#allocation5 + $0x400] ss:$16 sps:$4 sm:$0xff]   ;;  %v4772_v29 = vld [vmem:[#allocation5 + $0x4ac] ss:$16 sps:$4 sm:$0xff]  }
  0x8d   :  { %3276 = vmatprep.mubr.bf16.mxu0 %v3949_v30  ;;  %3604 = vmatprep.mubr.bf16.mxu1 %v3949_v30  ;;  %v4767_v30 = vld [vmem:[#allocation5 + $0x4a0] ss:$16 sps:$4 sm:$0xff]  }
  0x8f   :  { %3247 = vmatpush1.bf16.msra.mxu0 %v4645_v9  ;;  %3575 = vmatpush1.bf16.msra.mxu1 %v4648_v10  ;;  %v4740_v9 = vld [vmem:[#allocation5 + $0x408] ss:$16 sps:$4 sm:$0xff]   ;;  %v4745_v10 = vld [vmem:[#allocation5 + $0x424] ss:$16 sps:$4 sm:$0xff]  }
  0x90   :  { %3248 = vmatprep.subr.bf16.mxu0 %v4653_v11  ;;  %3576 = vmatprep.subr.bf16.mxu1 %v4656_v12  ;;  %v5529_v11 = vld [vmem:[#allocation2 + $0x10] sm:$0xff]  ;;  %v4748_v12 = vld [vmem:[#allocation5 + $0x42c] ss:$16 sps:$4 sm:$0xff]  }
  0x93   :  { %3249 = vmatpush1.bf16.msra.mxu0 %v4651_v13  ;;  %3577 = vmatpush1.bf16.msra.mxu1 %v4654_v14  ;;  %v3951_v13 = vcombine.high %v5529_v11, %v5529_v11  ;;  %v4743_v14 = vld [vmem:[#allocation5 + $0x420] ss:$16 sps:$4 sm:$0xff]  }
  0x94   :  { %3250 = vmatprep.subr.bf16.mxu0 %v4659_v15  ;;  %3578 = vmatprep.subr.bf16.mxu1 %v4662_v16  ;;  %v4746_v15 = vld [vmem:[#allocation5 + $0x428] ss:$16 sps:$4 sm:$0xff]   ;;  %v4751_v16 = vld [vmem:[#allocation5 + $0x444] ss:$16 sps:$4 sm:$0xff]  }
  0x97   :  { %3251 = vmatpush1.bf16.msra.mxu0 %v4657_v17  ;;  %3579 = vmatpush1.bf16.msra.mxu1 %v4660_v18  ;;  %v4754_v17 = vld [vmem:[#allocation5 + $0x44c] ss:$16 sps:$4 sm:$0xff]   ;;  %v4749_v18 = vld [vmem:[#allocation5 + $0x440] ss:$16 sps:$4 sm:$0xff]  }
  0x98   :  { %3252 = vmatprep.subr.bf16.mxu0 %v4665_v19  ;;  %3580 = vmatprep.subr.bf16.mxu1 %v4668_v20  ;;  %v4752_v19 = vld [vmem:[#allocation5 + $0x448] ss:$16 sps:$4 sm:$0xff]   ;;  %v4757_v20 = vld [vmem:[#allocation5 + $0x464] ss:$16 sps:$4 sm:$0xff]  }
  0x9b   :  { %3253 = vmatpush1.bf16.msra.mxu0 %v4663_v21  ;;  %3581 = vmatpush1.bf16.msra.mxu1 %v4666_v22  ;;  %v4760_v21 = vld [vmem:[#allocation5 + $0x46c] ss:$16 sps:$4 sm:$0xff]   ;;  %v4755_v22 = vld [vmem:[#allocation5 + $0x460] ss:$16 sps:$4 sm:$0xff]  }
  0x9c   :  { %3254 = vmatprep.subr.bf16.mxu0 %v4671_v23  ;;  %3582 = vmatprep.subr.bf16.mxu1 %v4674_v24  ;;  %v4758_v23 = vld [vmem:[#allocation5 + $0x468] ss:$16 sps:$4 sm:$0xff]   ;;  %v4763_v24 = vld [vmem:[#allocation5 + $0x484] ss:$16 sps:$4 sm:$0xff]  }
  0x9f   :  { %3255 = vmatpush1.bf16.msra.mxu0 %v4669_v25  ;;  %3583 = vmatpush1.bf16.msra.mxu1 %v4672_v26  ;;  %v4766_v25 = vld [vmem:[#allocation5 + $0x48c] ss:$16 sps:$4 sm:$0xff]   ;;  %v4761_v26 = vld [vmem:[#allocation5 + $0x480] ss:$16 sps:$4 sm:$0xff]  }
  0xa0   :  { %3256 = vmatprep.subr.bf16.mxu0 %v4677_v27  ;;  %3584 = vmatprep.subr.bf16.mxu1 %v4680_v28  ;;  %v4764_v27 = vld [vmem:[#allocation5 + $0x488] ss:$16 sps:$4 sm:$0xff]   ;;  %v4769_v28 = vld [vmem:[#allocation5 + $0x4a4] ss:$16 sps:$4 sm:$0xff]  }
  0xa3   :  { %3257 = vmatpush1.bf16.msra.mxu0 %v4675_v31  ;;  %3585 = vmatpush1.bf16.msra.mxu1 %v4678_v32  ;;  %v4770_v31 = vld [vmem:[#allocation5 + $0x4a8] ss:$16 sps:$4 sm:$0xff]   ;;  %v4775_v32 = vld [vmem:[#allocation5 + $0x4c4] ss:$16 sps:$4 sm:$0xff]  }
  0xa4   :  { %3258 = vmatprep.subr.bf16.mxu0 %v4683_v33  ;;  %3586 = vmatprep.subr.bf16.mxu1 %v4686_v34  ;;  %v4778_v33 = vld [vmem:[#allocation5 + $0x4cc] ss:$16 sps:$4 sm:$0xff]   ;;  %v4773_v34 = vld [vmem:[#allocation5 + $0x4c0] ss:$16 sps:$4 sm:$0xff]  }
  0xa7   :  { %3259 = vmatpush1.bf16.msra.mxu0 %v4681_v35  ;;  %3587 = vmatpush1.bf16.msra.mxu1 %v4684_v36  ;;  %v4776_v35 = vld [vmem:[#allocation5 + $0x4c8] ss:$16 sps:$4 sm:$0xff]   ;;  %v4781_v36 = vld [vmem:[#allocation5 + $0x4e4] ss:$16 sps:$4 sm:$0xff]  }
  0xa8   :  { %3260 = vmatprep.subr.bf16.mxu0 %v4689_v37  ;;  %3588 = vmatprep.subr.bf16.mxu1 %v4692_v38  ;;  %v4784_v37 = vld [vmem:[#allocation5 + $0x4ec] ss:$16 sps:$4 sm:$0xff]   ;;  %v4779_v38 = vld [vmem:[#allocation5 + $0x4e0] ss:$16 sps:$4 sm:$0xff]  }
  0xab   :  { %3261 = vmatpush1.bf16.msra.mxu0 %v4687_v39  ;;  %3589 = vmatpush1.bf16.msra.mxu1 %v4690_v40  ;;  %v4782_v39 = vld [vmem:[#allocation5 + $0x4e8] ss:$16 sps:$4 sm:$0xff]   ;;  %v4787_v40 = vld [vmem:[#allocation5 + $0x504] ss:$16 sps:$4 sm:$0xff]  }
  0xac   :  { %3262 = vmatprep.subr.bf16.mxu0 %v4695_v41  ;;  %3590 = vmatprep.subr.bf16.mxu1 %v4698_v42  ;;  %v4790_v41 = vld [vmem:[#allocation5 + $0x50c] ss:$16 sps:$4 sm:$0xff]   ;;  %v4785_v42 = vld [vmem:[#allocation5 + $0x500] ss:$16 sps:$4 sm:$0xff]  }
  0xaf   :  { %3263 = vmatpush1.bf16.msra.mxu0 %v4693_v43  ;;  %3591 = vmatpush1.bf16.msra.mxu1 %v4696_v44  ;;  %v4788_v43 = vld [vmem:[#allocation5 + $0x508] ss:$16 sps:$4 sm:$0xff]   ;;  %v4793_v44 = vld [vmem:[#allocation5 + $0x524] ss:$16 sps:$4 sm:$0xff]  }
  0xb0   :  { %3264 = vmatprep.subr.bf16.mxu0 %v4701_v45  ;;  %3592 = vmatprep.subr.bf16.mxu1 %v4704_v46  ;;  %v4796_v45 = vld [vmem:[#allocation5 + $0x52c] ss:$16 sps:$4 sm:$0xff]   ;;  %v4791_v46 = vld [vmem:[#allocation5 + $0x520] ss:$16 sps:$4 sm:$0xff]  }
  0xb3   :  { %3265 = vmatpush1.bf16.msra.mxu0 %v4699_v47  ;;  %3593 = vmatpush1.bf16.msra.mxu1 %v4702_v48  ;;  %v4794_v47 = vld [vmem:[#allocation5 + $0x528] ss:$16 sps:$4 sm:$0xff]   ;;  %v4799_v48 = vld [vmem:[#allocation5 + $0x544] ss:$16 sps:$4 sm:$0xff]  }
  0xb4   :  { %3266 = vmatprep.subr.bf16.mxu0 %v4707_v49  ;;  %3594 = vmatprep.subr.bf16.mxu1 %v4710_v50  ;;  %v4802_v49 = vld [vmem:[#allocation5 + $0x54c] ss:$16 sps:$4 sm:$0xff]   ;;  %v4797_v50 = vld [vmem:[#allocation5 + $0x540] ss:$16 sps:$4 sm:$0xff]  }
  0xb7   :  { %3267 = vmatpush1.bf16.msra.mxu0 %v4705_v51  ;;  %3595 = vmatpush1.bf16.msra.mxu1 %v4708_v52  ;;  %v4800_v51 = vld [vmem:[#allocation5 + $0x548] ss:$16 sps:$4 sm:$0xff]   ;;  %v4805_v52 = vld [vmem:[#allocation5 + $0x564] ss:$16 sps:$4 sm:$0xff]  }
  0xb8   :  { %3268 = vmatprep.subr.bf16.mxu0 %v4713_v53  ;;  %3596 = vmatprep.subr.bf16.mxu1 %v4716_v54  ;;  %v4808_v53 = vld [vmem:[#allocation5 + $0x56c] ss:$16 sps:$4 sm:$0xff]   ;;  %v4803_v54 = vld [vmem:[#allocation5 + $0x560] ss:$16 sps:$4 sm:$0xff]  }
  0xbb   :  { %3269 = vmatpush1.bf16.msra.mxu0 %v4711_v55  ;;  %3597 = vmatpush1.bf16.msra.mxu1 %v4714_v56  ;;  %v4806_v55 = vld [vmem:[#allocation5 + $0x568] ss:$16 sps:$4 sm:$0xff]   ;;  %v4811_v56 = vld [vmem:[#allocation5 + $0x584] ss:$16 sps:$4 sm:$0xff]  }
  0xbc   :  { %3270 = vmatprep.subr.bf16.mxu0 %v4719_v57  ;;  %3598 = vmatprep.subr.bf16.mxu1 %v4722_v58  ;;  %v4814_v57 = vld [vmem:[#allocation5 + $0x58c] ss:$16 sps:$4 sm:$0xff]   ;;  %v4809_v58 = vld [vmem:[#allocation5 + $0x580] ss:$16 sps:$4 sm:$0xff]  }
  0xbf   :  { %3271 = vmatpush1.bf16.msra.mxu0 %v4717_v59  ;;  %3599 = vmatpush1.bf16.msra.mxu1 %v4720_v60  ;;  %v4812_v59 = vld [vmem:[#allocation5 + $0x588] ss:$16 sps:$4 sm:$0xff]   ;;  %v4817_v60 = vld [vmem:[#allocation5 + $0x5a4] ss:$16 sps:$4 sm:$0xff]  }
  0xc0   :  { %3272 = vmatprep.subr.bf16.mxu0 %v4725_v61  ;;  %3600 = vmatprep.subr.bf16.mxu1 %v4728_v62  ;;  %v4820_v61 = vld [vmem:[#allocation5 + $0x5ac] ss:$16 sps:$4 sm:$0xff]   ;;  %v4815_v62 = vld [vmem:[#allocation5 + $0x5a0] ss:$16 sps:$4 sm:$0xff]  }
  0xc3   :  { %3273 = vmatpush1.bf16.msra.mxu0 %v4723_v63  ;;  %3601 = vmatpush1.bf16.msra.mxu1 %v4726_v0  ;;  %v4818_v63 = vld [vmem:[#allocation5 + $0x5a8] ss:$16 sps:$4 sm:$0xff]   ;;  %v4823_v0 = vld [vmem:[#allocation5 + $0x5c4] ss:$16 sps:$4 sm:$0xff]  }
  0xc4   :  { %3274 = vmatprep.subr.bf16.mxu0 %v4731_v1  ;;  %3602 = vmatprep.subr.bf16.mxu1 %v4734_v2  ;;  %v4826_v1 = vld [vmem:[#allocation5 + $0x5cc] ss:$16 sps:$4 sm:$0xff]   ;;  %v4821_v2 = vld [vmem:[#allocation5 + $0x5c0] ss:$16 sps:$4 sm:$0xff]  }
  0xc7   :  { %3275 = vmatpush1.bf16.msra.mxu0 %v4729_v3  ;;  %3603 = vmatpush1.bf16.msra.mxu1 %v4732_v4  ;;  %v4824_v3 = vld [vmem:[#allocation5 + $0x5c8] ss:$16 sps:$4 sm:$0xff]   ;;  %v4829_v4 = vld [vmem:[#allocation5 + $0x5e4] ss:$16 sps:$4 sm:$0xff]  }
  0xc8   :  { %3285 = vmatprep.subr.bf16.mxu0 %v4739_v5  ;;  %3613 = vmatprep.subr.bf16.mxu1 %v4742_v6  ;;  %v4832_v5 = vld [vmem:[#allocation5 + $0x5ec] ss:$16 sps:$4 sm:$0xff]   ;;  %v4827_v6 = vld [vmem:[#allocation5 + $0x5e0] ss:$16 sps:$4 sm:$0xff]  }
  0xca   :  { %3277 = vmatmul.mubr.bf16.vlgmr.msra.gmra.mrb[0].mxu0 %v3948_v7  ;;  %3605 = vmatmul.mubr.bf16.vlgmr.msra.gmra.mrb[0].mxu1 %v3948_v7  ;;  %v4830_v7 = vld [vmem:[#allocation5 + $0x5e8] ss:$16 sps:$4 sm:$0xff]  }
  0xcb   :  { %3286 = vmatpush1.bf16.msra.mxu0 %v4737_v8  ;;  %3614 = vmatpush1.bf16.msra.mxu1 %v4740_v9  ;;  %v4837_v8 = vld [vmem:[#allocation5 + $0x604] ss:$16 sps:$4 sm:$0xff]   ;;  %v4840_v9 = vld [vmem:[#allocation5 + $0x60c] ss:$16 sps:$4 sm:$0xff]  }
  0xcc   :  { %3287 = vmatprep.subr.bf16.mxu0 %v4745_v10  ;;  %3615 = vmatprep.subr.bf16.mxu1 %v4748_v12  ;;  %v4835_v10 = vld [vmem:[#allocation5 + $0x600] ss:$16 sps:$4 sm:$0xff]   ;;  %v3950_v12 = vcombine.low %v5529_v11, %v5529_v11  ;;  %v4852_v11 = vld [vmem:[#allocation5 + $0x64c] ss:$16 sps:$4 sm:$0xff]  }
  0xcd   :  { %3317 = vmatprep.mubr.bf16.mxu0 %v3951_v13  ;;  %3645 = vmatprep.mubr.bf16.mxu1 %v3951_v13  ;;  %v4838_v13 = vld [vmem:[#allocation5 + $0x608] ss:$16 sps:$4 sm:$0xff]  }
  0xcf   :  { %3288 = vmatpush1.bf16.msra.mxu0 %v4743_v14  ;;  %3616 = vmatpush1.bf16.msra.mxu1 %v4746_v15  ;;  %v5535_v14 = vld [vmem:[#allocation2 + $0x18] sm:$0xff]  ;;  %v4843_v15 = vld [vmem:[#allocation5 + $0x624] ss:$16 sps:$4 sm:$0xff]  }
  0xd0   :  { %3289 = vmatprep.subr.bf16.mxu0 %v4751_v16  ;;  %3617 = vmatprep.subr.bf16.mxu1 %v4754_v17  ;;  %v4846_v16 = vld [vmem:[#allocation5 + $0x62c] ss:$16 sps:$4 sm:$0xff]   ;;  %v3953_v17 = vcombine.high %v5535_v14, %v5535_v14 }
  0xd3   :  { %3290 = vmatpush1.bf16.msra.mxu0 %v4749_v18  ;;  %3618 = vmatpush1.bf16.msra.mxu1 %v4752_v19  ;;  %v4841_v18 = vld [vmem:[#allocation5 + $0x620] ss:$16 sps:$4 sm:$0xff]   ;;  %v4844_v19 = vld [vmem:[#allocation5 + $0x628] ss:$16 sps:$4 sm:$0xff]  }
  0xd4   :  { %3291 = vmatprep.subr.bf16.mxu0 %v4757_v20  ;;  %3619 = vmatprep.subr.bf16.mxu1 %v4760_v21  ;;  %v4849_v20 = vld [vmem:[#allocation5 + $0x644] ss:$16 sps:$4 sm:$0xff]   ;;  %v4847_v21 = vld [vmem:[#allocation5 + $0x640] ss:$16 sps:$4 sm:$0xff]  }
  0xd7   :  { %3292 = vmatpush1.bf16.msra.mxu0 %v4755_v22  ;;  %3620 = vmatpush1.bf16.msra.mxu1 %v4758_v23  ;;  %v4850_v22 = vld [vmem:[#allocation5 + $0x648] ss:$16 sps:$4 sm:$0xff]   ;;  %v4855_v23 = vld [vmem:[#allocation5 + $0x664] ss:$16 sps:$4 sm:$0xff]  }
  0xd8   :  { %3293 = vmatprep.subr.bf16.mxu0 %v4763_v24  ;;  %3621 = vmatprep.subr.bf16.mxu1 %v4766_v25  ;;  %v4858_v24 = vld [vmem:[#allocation5 + $0x66c] ss:$16 sps:$4 sm:$0xff]   ;;  %v4853_v25 = vld [vmem:[#allocation5 + $0x660] ss:$16 sps:$4 sm:$0xff]  }
  0xdb   :  { %3294 = vmatpush1.bf16.msra.mxu0 %v4761_v26  ;;  %3622 = vmatpush1.bf16.msra.mxu1 %v4764_v27  ;;  %v4856_v26 = vld [vmem:[#allocation5 + $0x668] ss:$16 sps:$4 sm:$0xff]   ;;  %v4861_v27 = vld [vmem:[#allocation5 + $0x684] ss:$16 sps:$4 sm:$0xff]  }
  0xdc   :  { %3295 = vmatprep.subr.bf16.mxu0 %v4769_v28  ;;  %3623 = vmatprep.subr.bf16.mxu1 %v4772_v29  ;;  %v4864_v28 = vld [vmem:[#allocation5 + $0x68c] ss:$16 sps:$4 sm:$0xff]   ;;  %v4859_v29 = vld [vmem:[#allocation5 + $0x680] ss:$16 sps:$4 sm:$0xff]  }
  0xdf   :  { %3296 = vmatpush1.bf16.msra.mxu0 %v4767_v30  ;;  %3624 = vmatpush1.bf16.msra.mxu1 %v4770_v31  ;;  %v4862_v30 = vld [vmem:[#allocation5 + $0x688] ss:$16 sps:$4 sm:$0xff]   ;;  %v4867_v31 = vld [vmem:[#allocation5 + $0x6a4] ss:$16 sps:$4 sm:$0xff]  }
  0xe0   :  { %3297 = vmatprep.subr.bf16.mxu0 %v4775_v32  ;;  %3625 = vmatprep.subr.bf16.mxu1 %v4778_v33  ;;  %v4870_v32 = vld [vmem:[#allocation5 + $0x6ac] ss:$16 sps:$4 sm:$0xff]   ;;  %v4865_v33 = vld [vmem:[#allocation5 + $0x6a0] ss:$16 sps:$4 sm:$0xff]  }
  0xe3   :  { %3298 = vmatpush1.bf16.msra.mxu0 %v4773_v34  ;;  %3626 = vmatpush1.bf16.msra.mxu1 %v4776_v35  ;;  %v4868_v34 = vld [vmem:[#allocation5 + $0x6a8] ss:$16 sps:$4 sm:$0xff]   ;;  %v4873_v35 = vld [vmem:[#allocation5 + $0x6c4] ss:$16 sps:$4 sm:$0xff]  }
  0xe4   :  { %3299 = vmatprep.subr.bf16.mxu0 %v4781_v36  ;;  %3627 = vmatprep.subr.bf16.mxu1 %v4784_v37  ;;  %v4876_v36 = vld [vmem:[#allocation5 + $0x6cc] ss:$16 sps:$4 sm:$0xff]   ;;  %v4871_v37 = vld [vmem:[#allocation5 + $0x6c0] ss:$16 sps:$4 sm:$0xff]  }
  0xe7   :  { %3300 = vmatpush1.bf16.msra.mxu0 %v4779_v38  ;;  %3628 = vmatpush1.bf16.msra.mxu1 %v4782_v39  ;;  %v4874_v38 = vld [vmem:[#allocation5 + $0x6c8] ss:$16 sps:$4 sm:$0xff]   ;;  %v4879_v39 = vld [vmem:[#allocation5 + $0x6e4] ss:$16 sps:$4 sm:$0xff]  }
  0xe8   :  { %3301 = vmatprep.subr.bf16.mxu0 %v4787_v40  ;;  %3629 = vmatprep.subr.bf16.mxu1 %v4790_v41  ;;  %v4882_v40 = vld [vmem:[#allocation5 + $0x6ec] ss:$16 sps:$4 sm:$0xff]   ;;  %v4877_v41 = vld [vmem:[#allocation5 + $0x6e0] ss:$16 sps:$4 sm:$0xff]  }
  0xeb   :  { %3302 = vmatpush1.bf16.msra.mxu0 %v4785_v42  ;;  %3630 = vmatpush1.bf16.msra.mxu1 %v4788_v43  ;;  %v4880_v42 = vld [vmem:[#allocation5 + $0x6e8] ss:$16 sps:$4 sm:$0xff]   ;;  %v4885_v43 = vld [vmem:[#allocation5 + $0x704] ss:$16 sps:$4 sm:$0xff]  }
  0xec   :  { %3303 = vmatprep.subr.bf16.mxu0 %v4793_v44  ;;  %3631 = vmatprep.subr.bf16.mxu1 %v4796_v45  ;;  %v4888_v44 = vld [vmem:[#allocation5 + $0x70c] ss:$16 sps:$4 sm:$0xff]   ;;  %v4883_v45 = vld [vmem:[#allocation5 + $0x700] ss:$16 sps:$4 sm:$0xff]  }
  0xef   :  { %3304 = vmatpush1.bf16.msra.mxu0 %v4791_v46  ;;  %3632 = vmatpush1.bf16.msra.mxu1 %v4794_v47  ;;  %v4886_v46 = vld [vmem:[#allocation5 + $0x708] ss:$16 sps:$4 sm:$0xff]   ;;  %v4891_v47 = vld [vmem:[#allocation5 + $0x724] ss:$16 sps:$4 sm:$0xff]  }
  0xf0   :  { %3305 = vmatprep.subr.bf16.mxu0 %v4799_v48  ;;  %3633 = vmatprep.subr.bf16.mxu1 %v4802_v49  ;;  %v4894_v48 = vld [vmem:[#allocation5 + $0x72c] ss:$16 sps:$4 sm:$0xff]   ;;  %v4889_v49 = vld [vmem:[#allocation5 + $0x720] ss:$16 sps:$4 sm:$0xff]  }
  0xf3   :  { %3306 = vmatpush1.bf16.msra.mxu0 %v4797_v50  ;;  %3634 = vmatpush1.bf16.msra.mxu1 %v4800_v51  ;;  %v4892_v50 = vld [vmem:[#allocation5 + $0x728] ss:$16 sps:$4 sm:$0xff]   ;;  %v4897_v51 = vld [vmem:[#allocation5 + $0x744] ss:$16 sps:$4 sm:$0xff]  }
  0xf4   :  { %3307 = vmatprep.subr.bf16.mxu0 %v4805_v52  ;;  %3635 = vmatprep.subr.bf16.mxu1 %v4808_v53  ;;  %v4900_v52 = vld [vmem:[#allocation5 + $0x74c] ss:$16 sps:$4 sm:$0xff]   ;;  %v4895_v53 = vld [vmem:[#allocation5 + $0x740] ss:$16 sps:$4 sm:$0xff]  }
  0xf7   :  { %3308 = vmatpush1.bf16.msra.mxu0 %v4803_v54  ;;  %3636 = vmatpush1.bf16.msra.mxu1 %v4806_v55  ;;  %v4898_v54 = vld [vmem:[#allocation5 + $0x748] ss:$16 sps:$4 sm:$0xff]   ;;  %v4903_v55 = vld [vmem:[#allocation5 + $0x764] ss:$16 sps:$4 sm:$0xff]  }
  0xf8   :  { %3309 = vmatprep.subr.bf16.mxu0 %v4811_v56  ;;  %3637 = vmatprep.subr.bf16.mxu1 %v4814_v57  ;;  %v4906_v56 = vld [vmem:[#allocation5 + $0x76c] ss:$16 sps:$4 sm:$0xff]   ;;  %v4901_v57 = vld [vmem:[#allocation5 + $0x760] ss:$16 sps:$4 sm:$0xff]  }
  0xfb   :  { %3310 = vmatpush1.bf16.msra.mxu0 %v4809_v58  ;;  %3638 = vmatpush1.bf16.msra.mxu1 %v4812_v59  ;;  %v4904_v58 = vld [vmem:[#allocation5 + $0x768] ss:$16 sps:$4 sm:$0xff]   ;;  %v4909_v59 = vld [vmem:[#allocation5 + $0x784] ss:$16 sps:$4 sm:$0xff]  }
  0xfc   :  { %3311 = vmatprep.subr.bf16.mxu0 %v4817_v60  ;;  %3639 = vmatprep.subr.bf16.mxu1 %v4820_v61  ;;  %v4912_v60 = vld [vmem:[#allocation5 + $0x78c] ss:$16 sps:$4 sm:$0xff]   ;;  %v4907_v61 = vld [vmem:[#allocation5 + $0x780] ss:$16 sps:$4 sm:$0xff]  }
  0xff   :  { %3312 = vmatpush1.bf16.msra.mxu0 %v4815_v62  ;;  %3640 = vmatpush1.bf16.msra.mxu1 %v4818_v63  ;;  %v4910_v62 = vld [vmem:[#allocation5 + $0x788] ss:$16 sps:$4 sm:$0xff]   ;;  %v4915_v63 = vld [vmem:[#allocation5 + $0x7a4] ss:$16 sps:$4 sm:$0xff]  }
 0x100   :  { %3313 = vmatprep.subr.bf16.mxu0 %v4823_v0  ;;  %3641 = vmatprep.subr.bf16.mxu1 %v4826_v1  ;;  %v4918_v0 = vld [vmem:[#allocation5 + $0x7ac] ss:$16 sps:$4 sm:$0xff]   ;;  %v4913_v1 = vld [vmem:[#allocation5 + $0x7a0] ss:$16 sps:$4 sm:$0xff]  }
 0x103   :  { %3314 = vmatpush1.bf16.msra.mxu0 %v4821_v2  ;;  %3642 = vmatpush1.bf16.msra.mxu1 %v4824_v3  ;;  %v4916_v2 = vld [vmem:[#allocation5 + $0x7a8] ss:$16 sps:$4 sm:$0xff]   ;;  %v4921_v3 = vld [vmem:[#allocation5 + $0x7c4] ss:$16 sps:$4 sm:$0xff]  }
 0x104   :  { %3315 = vmatprep.subr.bf16.mxu0 %v4829_v4  ;;  %3643 = vmatprep.subr.bf16.mxu1 %v4832_v5  ;;  %v4924_v4 = vld [vmem:[#allocation5 + $0x7cc] ss:$16 sps:$4 sm:$0xff]   ;;  %v4919_v5 = vld [vmem:[#allocation5 + $0x7c0] ss:$16 sps:$4 sm:$0xff]  }
 0x107   :  { %3316 = vmatpush1.bf16.msra.mxu0 %v4827_v6  ;;  %3644 = vmatpush1.bf16.msra.mxu1 %v4830_v7  ;;  %v4922_v6 = vld [vmem:[#allocation5 + $0x7c8] ss:$16 sps:$4 sm:$0xff]   ;;  %v4927_v7 = vld [vmem:[#allocation5 + $0x7e4] ss:$16 sps:$4 sm:$0xff]  }
 0x108   :  { %3326 = vmatprep.subr.bf16.mxu0 %v4837_v8  ;;  %3654 = vmatprep.subr.bf16.mxu1 %v4840_v9  ;;  %v4930_v8 = vld [vmem:[#allocation5 + $0x7ec] ss:$16 sps:$4 sm:$0xff]   ;;  %v4925_v9 = vld [vmem:[#allocation5 + $0x7e0] ss:$16 sps:$4 sm:$0xff]  }
 0x10a   :  { %3318 = vmatmul.mubr.bf16.vlgmr.msra.gmra.mrb[0].mxu0 %v3950_v12  ;;  %3646 = vmatmul.mubr.bf16.vlgmr.msra.gmra.mrb[0].mxu1 %v3950_v12  ;;  %v4935_v12 = vld [vmem:[#allocation5 + $0x804] ss:$16 sps:$4 sm:$0xff]  }
 0x10b   :  { %3327 = vmatpush1.bf16.msra.mxu0 %v4835_v10  ;;  %3655 = vmatpush1.bf16.msra.mxu1 %v4838_v13  ;;  %v4928_v10 = vld [vmem:[#allocation5 + $0x7e8] ss:$16 sps:$4 sm:$0xff]   ;;  %v4938_v13 = vld [vmem:[#allocation5 + $0x80c] ss:$16 sps:$4 sm:$0xff]  }
 0x10c   :  { %3328 = vmatprep.subr.bf16.mxu0 %v4843_v15  ;;  %3656 = vmatprep.subr.bf16.mxu1 %v4846_v16  ;;  %v4933_v15 = vld [vmem:[#allocation5 + $0x800] ss:$16 sps:$4 sm:$0xff]   ;;  %v3952_v16 = vcombine.low %v5535_v14, %v5535_v14  ;;  %v4947_v14 = vld [vmem:[#allocation5 + $0x844] ss:$16 sps:$4 sm:$0xff]  }
 0x10d   :  { %3358 = vmatprep.mubr.bf16.mxu0 %v3953_v17  ;;  %3686 = vmatprep.mubr.bf16.mxu1 %v3953_v17  ;;  %v5541_v17 = vld [vmem:[#allocation2 + $0x20] sm:$0xff] }
 0x10f   :  { %3329 = vmatpush1.bf16.msra.mxu0 %v4841_v18  ;;  %3657 = vmatpush1.bf16.msra.mxu1 %v4844_v19  ;;  %v4936_v18 = vld [vmem:[#allocation5 + $0x808] ss:$16 sps:$4 sm:$0xff]   ;;  %v4941_v19 = vld [vmem:[#allocation5 + $0x824] ss:$16 sps:$4 sm:$0xff]  }
 0x110   :  { %3330 = vmatprep.subr.bf16.mxu0 %v4849_v20  ;;  %3658 = vmatprep.subr.bf16.mxu1 %v4852_v11  ;;  %v4944_v20 = vld [vmem:[#allocation5 + $0x82c] ss:$16 sps:$4 sm:$0xff]   ;;  %v3955_v11 = vcombine.high %v5541_v17, %v5541_v17 }
 0x113   :  { %3331 = vmatpush1.bf16.msra.mxu0 %v4847_v21  ;;  %3659 = vmatpush1.bf16.msra.mxu1 %v4850_v22  ;;  %v4939_v21 = vld [vmem:[#allocation5 + $0x820] ss:$16 sps:$4 sm:$0xff]   ;;  %v4942_v22 = vld [vmem:[#allocation5 + $0x828] ss:$16 sps:$4 sm:$0xff]  }
 0x114   :  { %3332 = vmatprep.subr.bf16.mxu0 %v4855_v23  ;;  %3660 = vmatprep.subr.bf16.mxu1 %v4858_v24  ;;  %v4950_v23 = vld [vmem:[#allocation5 + $0x84c] ss:$16 sps:$4 sm:$0xff]   ;;  %v4945_v24 = vld [vmem:[#allocation5 + $0x840] ss:$16 sps:$4 sm:$0xff]  }
 0x117   :  { %3333 = vmatpush1.bf16.msra.mxu0 %v4853_v25  ;;  %3661 = vmatpush1.bf16.msra.mxu1 %v4856_v26  ;;  %v4948_v25 = vld [vmem:[#allocation5 + $0x848] ss:$16 sps:$4 sm:$0xff]   ;;  %v4953_v26 = vld [vmem:[#allocation5 + $0x864] ss:$16 sps:$4 sm:$0xff]  }
 0x118   :  { %3334 = vmatprep.subr.bf16.mxu0 %v4861_v27  ;;  %3662 = vmatprep.subr.bf16.mxu1 %v4864_v28  ;;  %v4956_v27 = vld [vmem:[#allocation5 + $0x86c] ss:$16 sps:$4 sm:$0xff]   ;;  %v4951_v28 = vld [vmem:[#allocation5 + $0x860] ss:$16 sps:$4 sm:$0xff]  }
 0x11b   :  { %3335 = vmatpush1.bf16.msra.mxu0 %v4859_v29  ;;  %3663 = vmatpush1.bf16.msra.mxu1 %v4862_v30  ;;  %v4954_v29 = vld [vmem:[#allocation5 + $0x868] ss:$16 sps:$4 sm:$0xff]   ;;  %v4959_v30 = vld [vmem:[#allocation5 + $0x884] ss:$16 sps:$4 sm:$0xff]  }
 0x11c   :  { %3336 = vmatprep.subr.bf16.mxu0 %v4867_v31  ;;  %3664 = vmatprep.subr.bf16.mxu1 %v4870_v32  ;;  %v4962_v31 = vld [vmem:[#allocation5 + $0x88c] ss:$16 sps:$4 sm:$0xff]   ;;  %v4957_v32 = vld [vmem:[#allocation5 + $0x880] ss:$16 sps:$4 sm:$0xff]  }
 0x11f   :  { %3337 = vmatpush1.bf16.msra.mxu0 %v4865_v33  ;;  %3665 = vmatpush1.bf16.msra.mxu1 %v4868_v34  ;;  %v4960_v33 = vld [vmem:[#allocation5 + $0x888] ss:$16 sps:$4 sm:$0xff]   ;;  %v4965_v34 = vld [vmem:[#allocation5 + $0x8a4] ss:$16 sps:$4 sm:$0xff]  }
 0x120   :  { %3338 = vmatprep.subr.bf16.mxu0 %v4873_v35  ;;  %3666 = vmatprep.subr.bf16.mxu1 %v4876_v36  ;;  %v4968_v35 = vld [vmem:[#allocation5 + $0x8ac] ss:$16 sps:$4 sm:$0xff]   ;;  %v4963_v36 = vld [vmem:[#allocation5 + $0x8a0] ss:$16 sps:$4 sm:$0xff]  }
 0x123   :  { %3339 = vmatpush1.bf16.msra.mxu0 %v4871_v37  ;;  %3667 = vmatpush1.bf16.msra.mxu1 %v4874_v38  ;;  %v4966_v37 = vld [vmem:[#allocation5 + $0x8a8] ss:$16 sps:$4 sm:$0xff]   ;;  %v4971_v38 = vld [vmem:[#allocation5 + $0x8c4] ss:$16 sps:$4 sm:$0xff]  }
 0x124   :  { %3340 = vmatprep.subr.bf16.mxu0 %v4879_v39  ;;  %3668 = vmatprep.subr.bf16.mxu1 %v4882_v40  ;;  %v4974_v39 = vld [vmem:[#allocation5 + $0x8cc] ss:$16 sps:$4 sm:$0xff]   ;;  %v4969_v40 = vld [vmem:[#allocation5 + $0x8c0] ss:$16 sps:$4 sm:$0xff]  }
 0x127   :  { %3341 = vmatpush1.bf16.msra.mxu0 %v4877_v41  ;;  %3669 = vmatpush1.bf16.msra.mxu1 %v4880_v42  ;;  %v4972_v41 = vld [vmem:[#allocation5 + $0x8c8] ss:$16 sps:$4 sm:$0xff]   ;;  %v4977_v42 = vld [vmem:[#allocation5 + $0x8e4] ss:$16 sps:$4 sm:$0xff]  }
 0x128   :  { %3342 = vmatprep.subr.bf16.mxu0 %v4885_v43  ;;  %3670 = vmatprep.subr.bf16.mxu1 %v4888_v44  ;;  %v4980_v43 = vld [vmem:[#allocation5 + $0x8ec] ss:$16 sps:$4 sm:$0xff]   ;;  %v4975_v44 = vld [vmem:[#allocation5 + $0x8e0] ss:$16 sps:$4 sm:$0xff]  }
 0x12b   :  { %3343 = vmatpush1.bf16.msra.mxu0 %v4883_v45  ;;  %3671 = vmatpush1.bf16.msra.mxu1 %v4886_v46  ;;  %v4978_v45 = vld [vmem:[#allocation5 + $0x8e8] ss:$16 sps:$4 sm:$0xff]   ;;  %v4983_v46 = vld [vmem:[#allocation5 + $0x904] ss:$16 sps:$4 sm:$0xff]  }
 0x12c   :  { %3344 = vmatprep.subr.bf16.mxu0 %v4891_v47  ;;  %3672 = vmatprep.subr.bf16.mxu1 %v4894_v48  ;;  %v4986_v47 = vld [vmem:[#allocation5 + $0x90c] ss:$16 sps:$4 sm:$0xff]   ;;  %v4981_v48 = vld [vmem:[#allocation5 + $0x900] ss:$16 sps:$4 sm:$0xff]  }
 0x12f   :  { %3345 = vmatpush1.bf16.msra.mxu0 %v4889_v49  ;;  %3673 = vmatpush1.bf16.msra.mxu1 %v4892_v50  ;;  %v4984_v49 = vld [vmem:[#allocation5 + $0x908] ss:$16 sps:$4 sm:$0xff]   ;;  %v4989_v50 = vld [vmem:[#allocation5 + $0x924] ss:$16 sps:$4 sm:$0xff]  }
 0x130   :  { %3346 = vmatprep.subr.bf16.mxu0 %v4897_v51  ;;  %3674 = vmatprep.subr.bf16.mxu1 %v4900_v52  ;;  %v4992_v51 = vld [vmem:[#allocation5 + $0x92c] ss:$16 sps:$4 sm:$0xff]   ;;  %v4987_v52 = vld [vmem:[#allocation5 + $0x920] ss:$16 sps:$4 sm:$0xff]  }
 0x133   :  { %3347 = vmatpush1.bf16.msra.mxu0 %v4895_v53  ;;  %3675 = vmatpush1.bf16.msra.mxu1 %v4898_v54  ;;  %v4990_v53 = vld [vmem:[#allocation5 + $0x928] ss:$16 sps:$4 sm:$0xff]   ;;  %v4995_v54 = vld [vmem:[#allocation5 + $0x944] ss:$16 sps:$4 sm:$0xff]  }
 0x134   :  { %3348 = vmatprep.subr.bf16.mxu0 %v4903_v55  ;;  %3676 = vmatprep.subr.bf16.mxu1 %v4906_v56  ;;  %v4998_v55 = vld [vmem:[#allocation5 + $0x94c] ss:$16 sps:$4 sm:$0xff]   ;;  %v4993_v56 = vld [vmem:[#allocation5 + $0x940] ss:$16 sps:$4 sm:$0xff]  }
 0x137   :  { %3349 = vmatpush1.bf16.msra.mxu0 %v4901_v57  ;;  %3677 = vmatpush1.bf16.msra.mxu1 %v4904_v58  ;;  %v4996_v57 = vld [vmem:[#allocation5 + $0x948] ss:$16 sps:$4 sm:$0xff]   ;;  %v5001_v58 = vld [vmem:[#allocation5 + $0x964] ss:$16 sps:$4 sm:$0xff]  }
 0x138   :  { %3350 = vmatprep.subr.bf16.mxu0 %v4909_v59  ;;  %3678 = vmatprep.subr.bf16.mxu1 %v4912_v60  ;;  %v5004_v59 = vld [vmem:[#allocation5 + $0x96c] ss:$16 sps:$4 sm:$0xff]   ;;  %v4999_v60 = vld [vmem:[#allocation5 + $0x960] ss:$16 sps:$4 sm:$0xff]  }
 0x13b   :  { %3351 = vmatpush1.bf16.msra.mxu0 %v4907_v61  ;;  %3679 = vmatpush1.bf16.msra.mxu1 %v4910_v62  ;;  %v5002_v61 = vld [vmem:[#allocation5 + $0x968] ss:$16 sps:$4 sm:$0xff]   ;;  %v5007_v62 = vld [vmem:[#allocation5 + $0x984] ss:$16 sps:$4 sm:$0xff]  }
 0x13c   :  { %3352 = vmatprep.subr.bf16.mxu0 %v4915_v63  ;;  %3680 = vmatprep.subr.bf16.mxu1 %v4918_v0  ;;  %v5010_v63 = vld [vmem:[#allocation5 + $0x98c] ss:$16 sps:$4 sm:$0xff]   ;;  %v5005_v0 = vld [vmem:[#allocation5 + $0x980] ss:$16 sps:$4 sm:$0xff]  }
 0x13f   :  { %3353 = vmatpush1.bf16.msra.mxu0 %v4913_v1  ;;  %3681 = vmatpush1.bf16.msra.mxu1 %v4916_v2  ;;  %v5008_v1 = vld [vmem:[#allocation5 + $0x988] ss:$16 sps:$4 sm:$0xff]   ;;  %v5013_v2 = vld [vmem:[#allocation5 + $0x9a4] ss:$16 sps:$4 sm:$0xff]  }
 0x140   :  { %3354 = vmatprep.subr.bf16.mxu0 %v4921_v3  ;;  %3682 = vmatprep.subr.bf16.mxu1 %v4924_v4  ;;  %v5016_v3 = vld [vmem:[#allocation5 + $0x9ac] ss:$16 sps:$4 sm:$0xff]   ;;  %v5011_v4 = vld [vmem:[#allocation5 + $0x9a0] ss:$16 sps:$4 sm:$0xff]  }
 0x143   :  { %3355 = vmatpush1.bf16.msra.mxu0 %v4919_v5  ;;  %3683 = vmatpush1.bf16.msra.mxu1 %v4922_v6  ;;  %v5014_v5 = vld [vmem:[#allocation5 + $0x9a8] ss:$16 sps:$4 sm:$0xff]   ;;  %v5019_v6 = vld [vmem:[#allocation5 + $0x9c4] ss:$16 sps:$4 sm:$0xff]  }
 0x144   :  { %3356 = vmatprep.subr.bf16.mxu0 %v4927_v7  ;;  %3684 = vmatprep.subr.bf16.mxu1 %v4930_v8  ;;  %v5022_v7 = vld [vmem:[#allocation5 + $0x9cc] ss:$16 sps:$4 sm:$0xff]   ;;  %v5017_v8 = vld [vmem:[#allocation5 + $0x9c0] ss:$16 sps:$4 sm:$0xff]  }
 0x147   :  { %3357 = vmatpush1.bf16.msra.mxu0 %v4925_v9  ;;  %3685 = vmatpush1.bf16.msra.mxu1 %v4928_v10  ;;  %v5020_v9 = vld [vmem:[#allocation5 + $0x9c8] ss:$16 sps:$4 sm:$0xff]   ;;  %v5025_v10 = vld [vmem:[#allocation5 + $0x9e4] ss:$16 sps:$4 sm:$0xff]  }
 0x148   :  { %3367 = vmatprep.subr.bf16.mxu0 %v4935_v12  ;;  %3695 = vmatprep.subr.bf16.mxu1 %v4938_v13  ;;  %v5028_v12 = vld [vmem:[#allocation5 + $0x9ec] ss:$16 sps:$4 sm:$0xff]   ;;  %v5023_v13 = vld [vmem:[#allocation5 + $0x9e0] ss:$16 sps:$4 sm:$0xff]  }
 0x14a   :  { %3359 = vmatmul.mubr.bf16.vlgmr.msra.gmra.mrb[0].mxu0 %v3952_v16  ;;  %3687 = vmatmul.mubr.bf16.vlgmr.msra.gmra.mrb[0].mxu1 %v3952_v16  ;;  %v5033_v16 = vld [vmem:[#allocation5 + $0xa04] ss:$16 sps:$4 sm:$0xff]  }
 0x14b   :  { %3368 = vmatpush1.bf16.msra.mxu0 %v4933_v15  ;;  %3696 = vmatpush1.bf16.msra.mxu1 %v4936_v18  ;;  %v5026_v15 = vld [vmem:[#allocation5 + $0x9e8] ss:$16 sps:$4 sm:$0xff]   ;;  %v5036_v18 = vld [vmem:[#allocation5 + $0xa0c] ss:$16 sps:$4 sm:$0xff]  }
 0x14c   :  { %3369 = vmatprep.subr.bf16.mxu0 %v4941_v19  ;;  %3697 = vmatprep.subr.bf16.mxu1 %v4944_v20  ;;  %v5545_v19 = vld [vmem:[#allocation2 + $0x28] sm:$0xff]  ;;  %v3954_v20 = vcombine.low %v5541_v17, %v5541_v17  ;;  %v5045_v17 = vld [vmem:[#allocation5 + $0xa44] ss:$16 sps:$4 sm:$0xff]  }
 0x14d   :  { %3399 = vmatprep.mubr.bf16.mxu0 %v3955_v11  ;;  %3727 = vmatprep.mubr.bf16.mxu1 %v3955_v11  ;;  %v5031_v11 = vld [vmem:[#allocation5 + $0xa00] ss:$16 sps:$4 sm:$0xff]  }
 0x14f   :  { %3370 = vmatpush1.bf16.msra.mxu0 %v4939_v21  ;;  %3698 = vmatpush1.bf16.msra.mxu1 %v4942_v22  ;;  %v5034_v21 = vld [vmem:[#allocation5 + $0xa08] ss:$16 sps:$4 sm:$0xff]   ;;  %v5039_v22 = vld [vmem:[#allocation5 + $0xa24] ss:$16 sps:$4 sm:$0xff]  }
 0x150   :  { %3371 = vmatprep.subr.bf16.mxu0 %v4947_v14  ;;  %3699 = vmatprep.subr.bf16.mxu1 %v4950_v23  ;;  %v5042_v14 = vld [vmem:[#allocation5 + $0xa2c] ss:$16 sps:$4 sm:$0xff]   ;;  %v3957_v23 = vcombine.high %v5545_v19, %v5545_v19 }
 0x153   :  { %3372 = vmatpush1.bf16.msra.mxu0 %v4945_v24  ;;  %3700 = vmatpush1.bf16.msra.mxu1 %v4948_v25  ;;  %v5037_v24 = vld [vmem:[#allocation5 + $0xa20] ss:$16 sps:$4 sm:$0xff]   ;;  %v5040_v25 = vld [vmem:[#allocation5 + $0xa28] ss:$16 sps:$4 sm:$0xff]  }
 0x154   :  { %3373 = vmatprep.subr.bf16.mxu0 %v4953_v26  ;;  %3701 = vmatprep.subr.bf16.mxu1 %v4956_v27  ;;  %v5048_v26 = vld [vmem:[#allocation5 + $0xa4c] ss:$16 sps:$4 sm:$0xff]   ;;  %v5043_v27 = vld [vmem:[#allocation5 + $0xa40] ss:$16 sps:$4 sm:$0xff]  }
 0x157   :  { %3374 = vmatpush1.bf16.msra.mxu0 %v4951_v28  ;;  %3702 = vmatpush1.bf16.msra.mxu1 %v4954_v29  ;;  %v5046_v28 = vld [vmem:[#allocation5 + $0xa48] ss:$16 sps:$4 sm:$0xff]   ;;  %v5051_v29 = vld [vmem:[#allocation5 + $0xa64] ss:$16 sps:$4 sm:$0xff]  }
 0x158   :  { %3375 = vmatprep.subr.bf16.mxu0 %v4959_v30  ;;  %3703 = vmatprep.subr.bf16.mxu1 %v4962_v31  ;;  %v5054_v30 = vld [vmem:[#allocation5 + $0xa6c] ss:$16 sps:$4 sm:$0xff]   ;;  %v5049_v31 = vld [vmem:[#allocation5 + $0xa60] ss:$16 sps:$4 sm:$0xff]  }
 0x15b   :  { %3376 = vmatpush1.bf16.msra.mxu0 %v4957_v32  ;;  %3704 = vmatpush1.bf16.msra.mxu1 %v4960_v33  ;;  %v5052_v32 = vld [vmem:[#allocation5 + $0xa68] ss:$16 sps:$4 sm:$0xff]   ;;  %v5057_v33 = vld [vmem:[#allocation5 + $0xa84] ss:$16 sps:$4 sm:$0xff]  }
 0x15c   :  { %3377 = vmatprep.subr.bf16.mxu0 %v4965_v34  ;;  %3705 = vmatprep.subr.bf16.mxu1 %v4968_v35  ;;  %v5060_v34 = vld [vmem:[#allocation5 + $0xa8c] ss:$16 sps:$4 sm:$0xff]   ;;  %v5055_v35 = vld [vmem:[#allocation5 + $0xa80] ss:$16 sps:$4 sm:$0xff]  }
 0x15f   :  { %3378 = vmatpush1.bf16.msra.mxu0 %v4963_v36  ;;  %3706 = vmatpush1.bf16.msra.mxu1 %v4966_v37  ;;  %v5058_v36 = vld [vmem:[#allocation5 + $0xa88] ss:$16 sps:$4 sm:$0xff]   ;;  %v5063_v37 = vld [vmem:[#allocation5 + $0xaa4] ss:$16 sps:$4 sm:$0xff]  }
 0x160   :  { %3379 = vmatprep.subr.bf16.mxu0 %v4971_v38  ;;  %3707 = vmatprep.subr.bf16.mxu1 %v4974_v39  ;;  %v5066_v38 = vld [vmem:[#allocation5 + $0xaac] ss:$16 sps:$4 sm:$0xff]   ;;  %v5061_v39 = vld [vmem:[#allocation5 + $0xaa0] ss:$16 sps:$4 sm:$0xff]  }
 0x163   :  { %3380 = vmatpush1.bf16.msra.mxu0 %v4969_v40  ;;  %3708 = vmatpush1.bf16.msra.mxu1 %v4972_v41  ;;  %v5064_v40 = vld [vmem:[#allocation5 + $0xaa8] ss:$16 sps:$4 sm:$0xff]   ;;  %v5069_v41 = vld [vmem:[#allocation5 + $0xac4] ss:$16 sps:$4 sm:$0xff]  }
 0x164   :  { %3381 = vmatprep.subr.bf16.mxu0 %v4977_v42  ;;  %3709 = vmatprep.subr.bf16.mxu1 %v4980_v43  ;;  %v5072_v42 = vld [vmem:[#allocation5 + $0xacc] ss:$16 sps:$4 sm:$0xff]   ;;  %v5067_v43 = vld [vmem:[#allocation5 + $0xac0] ss:$16 sps:$4 sm:$0xff]  }
 0x167   :  { %3382 = vmatpush1.bf16.msra.mxu0 %v4975_v44  ;;  %3710 = vmatpush1.bf16.msra.mxu1 %v4978_v45  ;;  %v5070_v44 = vld [vmem:[#allocation5 + $0xac8] ss:$16 sps:$4 sm:$0xff]   ;;  %v5075_v45 = vld [vmem:[#allocation5 + $0xae4] ss:$16 sps:$4 sm:$0xff]  }
 0x168   :  { %3383 = vmatprep.subr.bf16.mxu0 %v4983_v46  ;;  %3711 = vmatprep.subr.bf16.mxu1 %v4986_v47  ;;  %v5078_v46 = vld [vmem:[#allocation5 + $0xaec] ss:$16 sps:$4 sm:$0xff]   ;;  %v5073_v47 = vld [vmem:[#allocation5 + $0xae0] ss:$16 sps:$4 sm:$0xff]  }
 0x16b   :  { %3384 = vmatpush1.bf16.msra.mxu0 %v4981_v48  ;;  %3712 = vmatpush1.bf16.msra.mxu1 %v4984_v49  ;;  %v5076_v48 = vld [vmem:[#allocation5 + $0xae8] ss:$16 sps:$4 sm:$0xff]   ;;  %v5081_v49 = vld [vmem:[#allocation5 + $0xb04] ss:$16 sps:$4 sm:$0xff]  }
 0x16c   :  { %3385 = vmatprep.subr.bf16.mxu0 %v4989_v50  ;;  %3713 = vmatprep.subr.bf16.mxu1 %v4992_v51  ;;  %v5084_v50 = vld [vmem:[#allocation5 + $0xb0c] ss:$16 sps:$4 sm:$0xff]   ;;  %v5079_v51 = vld [vmem:[#allocation5 + $0xb00] ss:$16 sps:$4 sm:$0xff]  }
 0x16f   :  { %3386 = vmatpush1.bf16.msra.mxu0 %v4987_v52  ;;  %3714 = vmatpush1.bf16.msra.mxu1 %v4990_v53  ;;  %v5082_v52 = vld [vmem:[#allocation5 + $0xb08] ss:$16 sps:$4 sm:$0xff]   ;;  %v5087_v53 = vld [vmem:[#allocation5 + $0xb24] ss:$16 sps:$4 sm:$0xff]  }
 0x170   :  { %3387 = vmatprep.subr.bf16.mxu0 %v4995_v54  ;;  %3715 = vmatprep.subr.bf16.mxu1 %v4998_v55  ;;  %v5090_v54 = vld [vmem:[#allocation5 + $0xb2c] ss:$16 sps:$4 sm:$0xff]   ;;  %v5085_v55 = vld [vmem:[#allocation5 + $0xb20] ss:$16 sps:$4 sm:$0xff]  }
 0x173   :  { %3388 = vmatpush1.bf16.msra.mxu0 %v4993_v56  ;;  %3716 = vmatpush1.bf16.msra.mxu1 %v4996_v57  ;;  %v5088_v56 = vld [vmem:[#allocation5 + $0xb28] ss:$16 sps:$4 sm:$0xff]   ;;  %v5093_v57 = vld [vmem:[#allocation5 + $0xb44] ss:$16 sps:$4 sm:$0xff]  }
 0x174   :  { %3389 = vmatprep.subr.bf16.mxu0 %v5001_v58  ;;  %3717 = vmatprep.subr.bf16.mxu1 %v5004_v59  ;;  %v5096_v58 = vld [vmem:[#allocation5 + $0xb4c] ss:$16 sps:$4 sm:$0xff]   ;;  %v5091_v59 = vld [vmem:[#allocation5 + $0xb40] ss:$16 sps:$4 sm:$0xff]  }
 0x177   :  { %3390 = vmatpush1.bf16.msra.mxu0 %v4999_v60  ;;  %3718 = vmatpush1.bf16.msra.mxu1 %v5002_v61  ;;  %v5094_v60 = vld [vmem:[#allocation5 + $0xb48] ss:$16 sps:$4 sm:$0xff]   ;;  %v5099_v61 = vld [vmem:[#allocation5 + $0xb64] ss:$16 sps:$4 sm:$0xff]  }
 0x178   :  { %3391 = vmatprep.subr.bf16.mxu0 %v5007_v62  ;;  %3719 = vmatprep.subr.bf16.mxu1 %v5010_v63  ;;  %v5102_v62 = vld [vmem:[#allocation5 + $0xb6c] ss:$16 sps:$4 sm:$0xff]   ;;  %v5097_v63 = vld [vmem:[#allocation5 + $0xb60] ss:$16 sps:$4 sm:$0xff]  }
 0x17b   :  { %3392 = vmatpush1.bf16.msra.mxu0 %v5005_v0  ;;  %3720 = vmatpush1.bf16.msra.mxu1 %v5008_v1  ;;  %v5100_v0 = vld [vmem:[#allocation5 + $0xb68] ss:$16 sps:$4 sm:$0xff]   ;;  %v5105_v1 = vld [vmem:[#allocation5 + $0xb84] ss:$16 sps:$4 sm:$0xff]  }
 0x17c   :  { %3393 = vmatprep.subr.bf16.mxu0 %v5013_v2  ;;  %3721 = vmatprep.subr.bf16.mxu1 %v5016_v3  ;;  %v5108_v2 = vld [vmem:[#allocation5 + $0xb8c] ss:$16 sps:$4 sm:$0xff]   ;;  %v5103_v3 = vld [vmem:[#allocation5 + $0xb80] ss:$16 sps:$4 sm:$0xff]  }
 0x17f   :  { %3394 = vmatpush1.bf16.msra.mxu0 %v5011_v4  ;;  %3722 = vmatpush1.bf16.msra.mxu1 %v5014_v5  ;;  %v5106_v4 = vld [vmem:[#allocation5 + $0xb88] ss:$16 sps:$4 sm:$0xff]   ;;  %v5111_v5 = vld [vmem:[#allocation5 + $0xba4] ss:$16 sps:$4 sm:$0xff]  }
 0x180   :  { %3395 = vmatprep.subr.bf16.mxu0 %v5019_v6  ;;  %3723 = vmatprep.subr.bf16.mxu1 %v5022_v7  ;;  %v5114_v6 = vld [vmem:[#allocation5 + $0xbac] ss:$16 sps:$4 sm:$0xff]   ;;  %v5109_v7 = vld [vmem:[#allocation5 + $0xba0] ss:$16 sps:$4 sm:$0xff]  }
 0x183   :  { %3396 = vmatpush1.bf16.msra.mxu0 %v5017_v8  ;;  %3724 = vmatpush1.bf16.msra.mxu1 %v5020_v9  ;;  %v5112_v8 = vld [vmem:[#allocation5 + $0xba8] ss:$16 sps:$4 sm:$0xff]   ;;  %v5117_v9 = vld [vmem:[#allocation5 + $0xbc4] ss:$16 sps:$4 sm:$0xff]  }
 0x184   :  { %3397 = vmatprep.subr.bf16.mxu0 %v5025_v10  ;;  %3725 = vmatprep.subr.bf16.mxu1 %v5028_v12  ;;  %v5120_v10 = vld [vmem:[#allocation5 + $0xbcc] ss:$16 sps:$4 sm:$0xff]   ;;  %v5115_v12 = vld [vmem:[#allocation5 + $0xbc0] ss:$16 sps:$4 sm:$0xff]  }
 0x187   :  { %3398 = vmatpush1.bf16.msra.mxu0 %v5023_v13  ;;  %3726 = vmatpush1.bf16.msra.mxu1 %v5026_v15  ;;  %v5118_v13 = vld [vmem:[#allocation5 + $0xbc8] ss:$16 sps:$4 sm:$0xff]   ;;  %v5123_v15 = vld [vmem:[#allocation5 + $0xbe4] ss:$16 sps:$4 sm:$0xff]  }
 0x188   :  { %3408 = vmatprep.subr.bf16.mxu0 %v5033_v16  ;;  %3736 = vmatprep.subr.bf16.mxu1 %v5036_v18  ;;  %v5126_v16 = vld [vmem:[#allocation5 + $0xbec] ss:$16 sps:$4 sm:$0xff]   ;;  %v5121_v18 = vld [vmem:[#allocation5 + $0xbe0] ss:$16 sps:$4 sm:$0xff]  }
 0x18a   :  { %3400 = vmatmul.mubr.bf16.vlgmr.msra.gmra.mrb[0].mxu0 %v3954_v20  ;;  %3728 = vmatmul.mubr.bf16.vlgmr.msra.gmra.mrb[0].mxu1 %v3954_v20  ;;  %v5124_v20 = vld [vmem:[#allocation5 + $0xbe8] ss:$16 sps:$4 sm:$0xff]  }
 0x18b   :  { %3409 = vmatpush1.bf16.msra.mxu0 %v5031_v11  ;;  %3737 = vmatpush1.bf16.msra.mxu1 %v5034_v21  ;;  %v5131_v11 = vld [vmem:[#allocation5 + $0xc04] ss:$16 sps:$4 sm:$0xff]   ;;  %v5134_v21 = vld [vmem:[#allocation5 + $0xc0c] ss:$16 sps:$4 sm:$0xff]  }
 0x18c   :  { %3410 = vmatprep.subr.bf16.mxu0 %v5039_v22  ;;  %3738 = vmatprep.subr.bf16.mxu1 %v5042_v14  ;;  %v3956_v22 = vcombine.low %v5545_v19, %v5545_v19  ;;  %v5553_v14 = vld [vmem:[#allocation2 + $0x30] sm:$0xff] }
 0x18d   :  { %3440 = vmatprep.mubr.bf16.mxu0 %v3957_v23  ;;  %3768 = vmatprep.mubr.bf16.mxu1 %v3957_v23  ;;  %v5129_v23 = vld [vmem:[#allocation5 + $0xc00] ss:$16 sps:$4 sm:$0xff]   ;;  %v5143_v19 = vld [vmem:[#allocation5 + $0xc44] ss:$16 sps:$4 sm:$0xff]  }
 0x18f   :  { %3411 = vmatpush1.bf16.msra.mxu0 %v5037_v24  ;;  %3739 = vmatpush1.bf16.msra.mxu1 %v5040_v25  ;;  %v5132_v24 = vld [vmem:[#allocation5 + $0xc08] ss:$16 sps:$4 sm:$0xff]   ;;  %v5137_v25 = vld [vmem:[#allocation5 + $0xc24] ss:$16 sps:$4 sm:$0xff]  }
 0x190   :  { %3412 = vmatprep.subr.bf16.mxu0 %v5045_v17  ;;  %3740 = vmatprep.subr.bf16.mxu1 %v5048_v26  ;;  %v5140_v17 = vld [vmem:[#allocation5 + $0xc2c] ss:$16 sps:$4 sm:$0xff]   ;;  %v3959_v26 = vcombine.high %v5553_v14, %v5553_v14 }
 0x193   :  { %3413 = vmatpush1.bf16.msra.mxu0 %v5043_v27  ;;  %3741 = vmatpush1.bf16.msra.mxu1 %v5046_v28  ;;  %v5135_v27 = vld [vmem:[#allocation5 + $0xc20] ss:$16 sps:$4 sm:$0xff]   ;;  %v5138_v28 = vld [vmem:[#allocation5 + $0xc28] ss:$16 sps:$4 sm:$0xff]  }
 0x194   :  { %3414 = vmatprep.subr.bf16.mxu0 %v5051_v29  ;;  %3742 = vmatprep.subr.bf16.mxu1 %v5054_v30  ;;  %v5146_v29 = vld [vmem:[#allocation5 + $0xc4c] ss:$16 sps:$4 sm:$0xff]   ;;  %v5141_v30 = vld [vmem:[#allocation5 + $0xc40] ss:$16 sps:$4 sm:$0xff]  }
 0x197   :  { %3415 = vmatpush1.bf16.msra.mxu0 %v5049_v31  ;;  %3743 = vmatpush1.bf16.msra.mxu1 %v5052_v32  ;;  %v5144_v31 = vld [vmem:[#allocation5 + $0xc48] ss:$16 sps:$4 sm:$0xff]   ;;  %v5149_v32 = vld [vmem:[#allocation5 + $0xc64] ss:$16 sps:$4 sm:$0xff]  }
 0x198   :  { %3416 = vmatprep.subr.bf16.mxu0 %v5057_v33  ;;  %3744 = vmatprep.subr.bf16.mxu1 %v5060_v34  ;;  %v5152_v33 = vld [vmem:[#allocation5 + $0xc6c] ss:$16 sps:$4 sm:$0xff]   ;;  %v5147_v34 = vld [vmem:[#allocation5 + $0xc60] ss:$16 sps:$4 sm:$0xff]  }
 0x19b   :  { %3417 = vmatpush1.bf16.msra.mxu0 %v5055_v35  ;;  %3745 = vmatpush1.bf16.msra.mxu1 %v5058_v36  ;;  %v5150_v35 = vld [vmem:[#allocation5 + $0xc68] ss:$16 sps:$4 sm:$0xff]   ;;  %v5155_v36 = vld [vmem:[#allocation5 + $0xc84] ss:$16 sps:$4 sm:$0xff]  }
 0x19c   :  { %3418 = vmatprep.subr.bf16.mxu0 %v5063_v37  ;;  %3746 = vmatprep.subr.bf16.mxu1 %v5066_v38  ;;  %v5158_v37 = vld [vmem:[#allocation5 + $0xc8c] ss:$16 sps:$4 sm:$0xff]   ;;  %v5153_v38 = vld [vmem:[#allocation5 + $0xc80] ss:$16 sps:$4 sm:$0xff]  }
 0x19f   :  { %3419 = vmatpush1.bf16.msra.mxu0 %v5061_v39  ;;  %3747 = vmatpush1.bf16.msra.mxu1 %v5064_v40  ;;  %v5156_v39 = vld [vmem:[#allocation5 + $0xc88] ss:$16 sps:$4 sm:$0xff]   ;;  %v5161_v40 = vld [vmem:[#allocation5 + $0xca4] ss:$16 sps:$4 sm:$0xff]  }
 0x1a0   :  { %3420 = vmatprep.subr.bf16.mxu0 %v5069_v41  ;;  %3748 = vmatprep.subr.bf16.mxu1 %v5072_v42  ;;  %v5164_v41 = vld [vmem:[#allocation5 + $0xcac] ss:$16 sps:$4 sm:$0xff]   ;;  %v5159_v42 = vld [vmem:[#allocation5 + $0xca0] ss:$16 sps:$4 sm:$0xff]  }
 0x1a3   :  { %3421 = vmatpush1.bf16.msra.mxu0 %v5067_v43  ;;  %3749 = vmatpush1.bf16.msra.mxu1 %v5070_v44  ;;  %v5162_v43 = vld [vmem:[#allocation5 + $0xca8] ss:$16 sps:$4 sm:$0xff]   ;;  %v5167_v44 = vld [vmem:[#allocation5 + $0xcc4] ss:$16 sps:$4 sm:$0xff]  }
 0x1a4   :  { %3422 = vmatprep.subr.bf16.mxu0 %v5075_v45  ;;  %3750 = vmatprep.subr.bf16.mxu1 %v5078_v46  ;;  %v5170_v45 = vld [vmem:[#allocation5 + $0xccc] ss:$16 sps:$4 sm:$0xff]   ;;  %v5165_v46 = vld [vmem:[#allocation5 + $0xcc0] ss:$16 sps:$4 sm:$0xff]  }
 0x1a7   :  { %3423 = vmatpush1.bf16.msra.mxu0 %v5073_v47  ;;  %3751 = vmatpush1.bf16.msra.mxu1 %v5076_v48  ;;  %v5168_v47 = vld [vmem:[#allocation5 + $0xcc8] ss:$16 sps:$4 sm:$0xff]   ;;  %v5173_v48 = vld [vmem:[#allocation5 + $0xce4] ss:$16 sps:$4 sm:$0xff]  }
 0x1a8   :  { %3424 = vmatprep.subr.bf16.mxu0 %v5081_v49  ;;  %3752 = vmatprep.subr.bf16.mxu1 %v5084_v50  ;;  %v5176_v49 = vld [vmem:[#allocation5 + $0xcec] ss:$16 sps:$4 sm:$0xff]   ;;  %v5171_v50 = vld [vmem:[#allocation5 + $0xce0] ss:$16 sps:$4 sm:$0xff]  }
 0x1ab   :  { %3425 = vmatpush1.bf16.msra.mxu0 %v5079_v51  ;;  %3753 = vmatpush1.bf16.msra.mxu1 %v5082_v52  ;;  %v5174_v51 = vld [vmem:[#allocation5 + $0xce8] ss:$16 sps:$4 sm:$0xff]   ;;  %v5179_v52 = vld [vmem:[#allocation5 + $0xd04] ss:$16 sps:$4 sm:$0xff]  }
 0x1ac   :  { %3426 = vmatprep.subr.bf16.mxu0 %v5087_v53  ;;  %3754 = vmatprep.subr.bf16.mxu1 %v5090_v54  ;;  %v5182_v53 = vld [vmem:[#allocation5 + $0xd0c] ss:$16 sps:$4 sm:$0xff]   ;;  %v5177_v54 = vld [vmem:[#allocation5 + $0xd00] ss:$16 sps:$4 sm:$0xff]  }
 0x1af   :  { %3427 = vmatpush1.bf16.msra.mxu0 %v5085_v55  ;;  %3755 = vmatpush1.bf16.msra.mxu1 %v5088_v56  ;;  %v5180_v55 = vld [vmem:[#allocation5 + $0xd08] ss:$16 sps:$4 sm:$0xff]   ;;  %v5185_v56 = vld [vmem:[#allocation5 + $0xd24] ss:$16 sps:$4 sm:$0xff]  }
 0x1b0   :  { %3428 = vmatprep.subr.bf16.mxu0 %v5093_v57  ;;  %3756 = vmatprep.subr.bf16.mxu1 %v5096_v58  ;;  %v5188_v57 = vld [vmem:[#allocation5 + $0xd2c] ss:$16 sps:$4 sm:$0xff]   ;;  %v5183_v58 = vld [vmem:[#allocation5 + $0xd20] ss:$16 sps:$4 sm:$0xff]  }
 0x1b3   :  { %3429 = vmatpush1.bf16.msra.mxu0 %v5091_v59  ;;  %3757 = vmatpush1.bf16.msra.mxu1 %v5094_v60  ;;  %v5186_v59 = vld [vmem:[#allocation5 + $0xd28] ss:$16 sps:$4 sm:$0xff]   ;;  %v5191_v60 = vld [vmem:[#allocation5 + $0xd44] ss:$16 sps:$4 sm:$0xff]  }
 0x1b4   :  { %3430 = vmatprep.subr.bf16.mxu0 %v5099_v61  ;;  %3758 = vmatprep.subr.bf16.mxu1 %v5102_v62  ;;  %v5194_v61 = vld [vmem:[#allocation5 + $0xd4c] ss:$16 sps:$4 sm:$0xff]   ;;  %v5189_v62 = vld [vmem:[#allocation5 + $0xd40] ss:$16 sps:$4 sm:$0xff]  }
 0x1b7   :  { %3431 = vmatpush1.bf16.msra.mxu0 %v5097_v63  ;;  %3759 = vmatpush1.bf16.msra.mxu1 %v5100_v0  ;;  %v5192_v63 = vld [vmem:[#allocation5 + $0xd48] ss:$16 sps:$4 sm:$0xff]   ;;  %v5197_v0 = vld [vmem:[#allocation5 + $0xd64] ss:$16 sps:$4 sm:$0xff]  }
 0x1b8   :  { %3432 = vmatprep.subr.bf16.mxu0 %v5105_v1  ;;  %3760 = vmatprep.subr.bf16.mxu1 %v5108_v2  ;;  %v5200_v1 = vld [vmem:[#allocation5 + $0xd6c] ss:$16 sps:$4 sm:$0xff]   ;;  %v5195_v2 = vld [vmem:[#allocation5 + $0xd60] ss:$16 sps:$4 sm:$0xff]  }
 0x1bb   :  { %3433 = vmatpush1.bf16.msra.mxu0 %v5103_v3  ;;  %3761 = vmatpush1.bf16.msra.mxu1 %v5106_v4  ;;  %v5198_v3 = vld [vmem:[#allocation5 + $0xd68] ss:$16 sps:$4 sm:$0xff]   ;;  %v5203_v4 = vld [vmem:[#allocation5 + $0xd84] ss:$16 sps:$4 sm:$0xff]  }
 0x1bc   :  { %3434 = vmatprep.subr.bf16.mxu0 %v5111_v5  ;;  %3762 = vmatprep.subr.bf16.mxu1 %v5114_v6  ;;  %v5206_v5 = vld [vmem:[#allocation5 + $0xd8c] ss:$16 sps:$4 sm:$0xff]   ;;  %v5201_v6 = vld [vmem:[#allocation5 + $0xd80] ss:$16 sps:$4 sm:$0xff]  }
 0x1bf   :  { %3435 = vmatpush1.bf16.msra.mxu0 %v5109_v7  ;;  %3763 = vmatpush1.bf16.msra.mxu1 %v5112_v8  ;;  %v5204_v7 = vld [vmem:[#allocation5 + $0xd88] ss:$16 sps:$4 sm:$0xff]   ;;  %v5209_v8 = vld [vmem:[#allocation5 + $0xda4] ss:$16 sps:$4 sm:$0xff]  }
 0x1c0   :  { %3436 = vmatprep.subr.bf16.mxu0 %v5117_v9  ;;  %3764 = vmatprep.subr.bf16.mxu1 %v5120_v10  ;;  %v5212_v9 = vld [vmem:[#allocation5 + $0xdac] ss:$16 sps:$4 sm:$0xff]   ;;  %v5207_v10 = vld [vmem:[#allocation5 + $0xda0] ss:$16 sps:$4 sm:$0xff]  }
 0x1c3   :  { %3437 = vmatpush1.bf16.msra.mxu0 %v5115_v12  ;;  %3765 = vmatpush1.bf16.msra.mxu1 %v5118_v13  ;;  %v5210_v12 = vld [vmem:[#allocation5 + $0xda8] ss:$16 sps:$4 sm:$0xff]   ;;  %v5215_v13 = vld [vmem:[#allocation5 + $0xdc4] ss:$16 sps:$4 sm:$0xff]  }
 0x1c4   :  { %3438 = vmatprep.subr.bf16.mxu0 %v5123_v15  ;;  %3766 = vmatprep.subr.bf16.mxu1 %v5126_v16  ;;  %v5218_v15 = vld [vmem:[#allocation5 + $0xdcc] ss:$16 sps:$4 sm:$0xff]   ;;  %v5213_v16 = vld [vmem:[#allocation5 + $0xdc0] ss:$16 sps:$4 sm:$0xff]  }
 0x1c7   :  { %3439 = vmatpush1.bf16.msra.mxu0 %v5121_v18  ;;  %3767 = vmatpush1.bf16.msra.mxu1 %v5124_v20  ;;  %v5216_v18 = vld [vmem:[#allocation5 + $0xdc8] ss:$16 sps:$4 sm:$0xff]   ;;  %v5221_v20 = vld [vmem:[#allocation5 + $0xde4] ss:$16 sps:$4 sm:$0xff]  }
 0x1c8   :  { %3449 = vmatprep.subr.bf16.mxu0 %v5131_v11  ;;  %3777 = vmatprep.subr.bf16.mxu1 %v5134_v21  ;;  %v5224_v11 = vld [vmem:[#allocation5 + $0xdec] ss:$16 sps:$4 sm:$0xff]   ;;  %v5219_v21 = vld [vmem:[#allocation5 + $0xde0] ss:$16 sps:$4 sm:$0xff]  }
 0x1ca   :  { %3441 = vmatmul.mubr.bf16.vlgmr.msra.gmra.mrb[0].mxu0 %v3956_v22  ;;  %3769 = vmatmul.mubr.bf16.vlgmr.msra.gmra.mrb[0].mxu1 %v3956_v22  ;;  %v5222_v22 = vld [vmem:[#allocation5 + $0xde8] ss:$16 sps:$4 sm:$0xff]  }
 0x1cb   :  { %3450 = vmatpush1.bf16.msra.mxu0 %v5129_v23  ;;  %3778 = vmatpush1.bf16.msra.mxu1 %v5132_v24  ;;  %v5229_v23 = vld [vmem:[#allocation5 + $0xe04] ss:$16 sps:$4 sm:$0xff]   ;;  %v5232_v24 = vld [vmem:[#allocation5 + $0xe0c] ss:$16 sps:$4 sm:$0xff]  }
 0x1cc   :  { %3451 = vmatprep.subr.bf16.mxu0 %v5137_v25  ;;  %3779 = vmatprep.subr.bf16.mxu1 %v5140_v17  ;;  %v3958_v25 = vcombine.low %v5553_v14, %v5553_v14  ;;  %v5559_v17 = vld [vmem:[#allocation2 + $0x38] sm:$0xff]  ;;  %v5241_v14 = vld [vmem:[#allocation5 + $0xe44] ss:$16 sps:$4 sm:$0xff]  }
 0x1cd   :  { %3481 = vmatprep.mubr.bf16.mxu0 %v3959_v26  ;;  %3809 = vmatprep.mubr.bf16.mxu1 %v3959_v26  ;;  %v5227_v26 = vld [vmem:[#allocation5 + $0xe00] ss:$16 sps:$4 sm:$0xff]  }
 0x1cf   :  { %3452 = vmatpush1.bf16.msra.mxu0 %v5135_v27  ;;  %3780 = vmatpush1.bf16.msra.mxu1 %v5138_v28  ;;  %v5230_v27 = vld [vmem:[#allocation5 + $0xe08] ss:$16 sps:$4 sm:$0xff]   ;;  %v5235_v28 = vld [vmem:[#allocation5 + $0xe24] ss:$16 sps:$4 sm:$0xff]  }
 0x1d0   :  { %3453 = vmatprep.subr.bf16.mxu0 %v5143_v19  ;;  %3781 = vmatprep.subr.bf16.mxu1 %v5146_v29  ;;  %v5238_v19 = vld [vmem:[#allocation5 + $0xe2c] ss:$16 sps:$4 sm:$0xff]   ;;  %v3961_v29 = vcombine.high %v5559_v17, %v5559_v17 }
 0x1d3   :  { %3454 = vmatpush1.bf16.msra.mxu0 %v5141_v30  ;;  %3782 = vmatpush1.bf16.msra.mxu1 %v5144_v31  ;;  %v5233_v30 = vld [vmem:[#allocation5 + $0xe20] ss:$16 sps:$4 sm:$0xff]   ;;  %v5236_v31 = vld [vmem:[#allocation5 + $0xe28] ss:$16 sps:$4 sm:$0xff]  }
 0x1d4   :  { %3455 = vmatprep.subr.bf16.mxu0 %v5149_v32  ;;  %3783 = vmatprep.subr.bf16.mxu1 %v5152_v33  ;;  %v5244_v32 = vld [vmem:[#allocation5 + $0xe4c] ss:$16 sps:$4 sm:$0xff]   ;;  %v5239_v33 = vld [vmem:[#allocation5 + $0xe40] ss:$16 sps:$4 sm:$0xff]  }
 0x1d7   :  { %3456 = vmatpush1.bf16.msra.mxu0 %v5147_v34  ;;  %3784 = vmatpush1.bf16.msra.mxu1 %v5150_v35  ;;  %v5242_v34 = vld [vmem:[#allocation5 + $0xe48] ss:$16 sps:$4 sm:$0xff]   ;;  %v5247_v35 = vld [vmem:[#allocation5 + $0xe64] ss:$16 sps:$4 sm:$0xff]  }
 0x1d8   :  { %3457 = vmatprep.subr.bf16.mxu0 %v5155_v36  ;;  %3785 = vmatprep.subr.bf16.mxu1 %v5158_v37  ;;  %v5250_v36 = vld [vmem:[#allocation5 + $0xe6c] ss:$16 sps:$4 sm:$0xff]   ;;  %v5245_v37 = vld [vmem:[#allocation5 + $0xe60] ss:$16 sps:$4 sm:$0xff]  }
 0x1db   :  { %3458 = vmatpush1.bf16.msra.mxu0 %v5153_v38  ;;  %3786 = vmatpush1.bf16.msra.mxu1 %v5156_v39  ;;  %v5248_v38 = vld [vmem:[#allocation5 + $0xe68] ss:$16 sps:$4 sm:$0xff]   ;;  %v5253_v39 = vld [vmem:[#allocation5 + $0xe84] ss:$16 sps:$4 sm:$0xff]  }
 0x1dc   :  { %3459 = vmatprep.subr.bf16.mxu0 %v5161_v40  ;;  %3787 = vmatprep.subr.bf16.mxu1 %v5164_v41  ;;  %v5256_v40 = vld [vmem:[#allocation5 + $0xe8c] ss:$16 sps:$4 sm:$0xff]   ;;  %v5251_v41 = vld [vmem:[#allocation5 + $0xe80] ss:$16 sps:$4 sm:$0xff]  }
 0x1df   :  { %3460 = vmatpush1.bf16.msra.mxu0 %v5159_v42  ;;  %3788 = vmatpush1.bf16.msra.mxu1 %v5162_v43  ;;  %v5254_v42 = vld [vmem:[#allocation5 + $0xe88] ss:$16 sps:$4 sm:$0xff]   ;;  %v5259_v43 = vld [vmem:[#allocation5 + $0xea4] ss:$16 sps:$4 sm:$0xff]  }
 0x1e0   :  { %3461 = vmatprep.subr.bf16.mxu0 %v5167_v44  ;;  %3789 = vmatprep.subr.bf16.mxu1 %v5170_v45  ;;  %v5262_v44 = vld [vmem:[#allocation5 + $0xeac] ss:$16 sps:$4 sm:$0xff]   ;;  %v5257_v45 = vld [vmem:[#allocation5 + $0xea0] ss:$16 sps:$4 sm:$0xff]  }
 0x1e3   :  { %3462 = vmatpush1.bf16.msra.mxu0 %v5165_v46  ;;  %3790 = vmatpush1.bf16.msra.mxu1 %v5168_v47  ;;  %v5260_v46 = vld [vmem:[#allocation5 + $0xea8] ss:$16 sps:$4 sm:$0xff]   ;;  %v5265_v47 = vld [vmem:[#allocation5 + $0xec4] ss:$16 sps:$4 sm:$0xff]  }
 0x1e4   :  { %3463 = vmatprep.subr.bf16.mxu0 %v5173_v48  ;;  %3791 = vmatprep.subr.bf16.mxu1 %v5176_v49  ;;  %v5268_v48 = vld [vmem:[#allocation5 + $0xecc] ss:$16 sps:$4 sm:$0xff]   ;;  %v5263_v49 = vld [vmem:[#allocation5 + $0xec0] ss:$16 sps:$4 sm:$0xff]  }
 0x1e7   :  { %3464 = vmatpush1.bf16.msra.mxu0 %v5171_v50  ;;  %3792 = vmatpush1.bf16.msra.mxu1 %v5174_v51  ;;  %v5266_v50 = vld [vmem:[#allocation5 + $0xec8] ss:$16 sps:$4 sm:$0xff]   ;;  %v5271_v51 = vld [vmem:[#allocation5 + $0xee4] ss:$16 sps:$4 sm:$0xff]  }
 0x1e8   :  { %3465 = vmatprep.subr.bf16.mxu0 %v5179_v52  ;;  %3793 = vmatprep.subr.bf16.mxu1 %v5182_v53  ;;  %v5274_v52 = vld [vmem:[#allocation5 + $0xeec] ss:$16 sps:$4 sm:$0xff]   ;;  %v5269_v53 = vld [vmem:[#allocation5 + $0xee0] ss:$16 sps:$4 sm:$0xff]  }
 0x1eb   :  { %3466 = vmatpush1.bf16.msra.mxu0 %v5177_v54  ;;  %3794 = vmatpush1.bf16.msra.mxu1 %v5180_v55  ;;  %v5272_v54 = vld [vmem:[#allocation5 + $0xee8] ss:$16 sps:$4 sm:$0xff]   ;;  %v5277_v55 = vld [vmem:[#allocation5 + $0xf04] ss:$16 sps:$4 sm:$0xff]  }
 0x1ec   :  { %3467 = vmatprep.subr.bf16.mxu0 %v5185_v56  ;;  %3795 = vmatprep.subr.bf16.mxu1 %v5188_v57  ;;  %v5280_v56 = vld [vmem:[#allocation5 + $0xf0c] ss:$16 sps:$4 sm:$0xff]   ;;  %v5275_v57 = vld [vmem:[#allocation5 + $0xf00] ss:$16 sps:$4 sm:$0xff]  }
 0x1ef   :  { %3468 = vmatpush1.bf16.msra.mxu0 %v5183_v58  ;;  %3796 = vmatpush1.bf16.msra.mxu1 %v5186_v59  ;;  %v5278_v58 = vld [vmem:[#allocation5 + $0xf08] ss:$16 sps:$4 sm:$0xff]   ;;  %v5283_v59 = vld [vmem:[#allocation5 + $0xf24] ss:$16 sps:$4 sm:$0xff]  }
 0x1f0   :  { %3469 = vmatprep.subr.bf16.mxu0 %v5191_v60  ;;  %3797 = vmatprep.subr.bf16.mxu1 %v5194_v61  ;;  %v5286_v60 = vld [vmem:[#allocation5 + $0xf2c] ss:$16 sps:$4 sm:$0xff]   ;;  %v5281_v61 = vld [vmem:[#allocation5 + $0xf20] ss:$16 sps:$4 sm:$0xff]  }
 0x1f3   :  { %3470 = vmatpush1.bf16.msra.mxu0 %v5189_v62  ;;  %3798 = vmatpush1.bf16.msra.mxu1 %v5192_v63  ;;  %v5284_v62 = vld [vmem:[#allocation5 + $0xf28] ss:$16 sps:$4 sm:$0xff]   ;;  %v5289_v63 = vld [vmem:[#allocation5 + $0xf44] ss:$16 sps:$4 sm:$0xff]  }
 0x1f4   :  { %3471 = vmatprep.subr.bf16.mxu0 %v5197_v0  ;;  %3799 = vmatprep.subr.bf16.mxu1 %v5200_v1  ;;  %v5292_v0 = vld [vmem:[#allocation5 + $0xf4c] ss:$16 sps:$4 sm:$0xff]   ;;  %v5287_v1 = vld [vmem:[#allocation5 + $0xf40] ss:$16 sps:$4 sm:$0xff]  }
 0x1f7   :  { %3472 = vmatpush1.bf16.msra.mxu0 %v5195_v2  ;;  %3800 = vmatpush1.bf16.msra.mxu1 %v5198_v3  ;;  %v5290_v2 = vld [vmem:[#allocation5 + $0xf48] ss:$16 sps:$4 sm:$0xff]   ;;  %v5295_v3 = vld [vmem:[#allocation5 + $0xf64] ss:$16 sps:$4 sm:$0xff]  }
 0x1f8   :  { %3473 = vmatprep.subr.bf16.mxu0 %v5203_v4  ;;  %3801 = vmatprep.subr.bf16.mxu1 %v5206_v5  ;;  %v5298_v4 = vld [vmem:[#allocation5 + $0xf6c] ss:$16 sps:$4 sm:$0xff]   ;;  %v5293_v5 = vld [vmem:[#allocation5 + $0xf60] ss:$16 sps:$4 sm:$0xff]  }
 0x1fb   :  { %3474 = vmatpush1.bf16.msra.mxu0 %v5201_v6  ;;  %3802 = vmatpush1.bf16.msra.mxu1 %v5204_v7  ;;  %v5296_v6 = vld [vmem:[#allocation5 + $0xf68] ss:$16 sps:$4 sm:$0xff]   ;;  %v5301_v7 = vld [vmem:[#allocation5 + $0xf84] ss:$16 sps:$4 sm:$0xff]  }
 0x1fc   :  { %3475 = vmatprep.subr.bf16.mxu0 %v5209_v8  ;;  %3803 = vmatprep.subr.bf16.mxu1 %v5212_v9  ;;  %v5304_v8 = vld [vmem:[#allocation5 + $0xf8c] ss:$16 sps:$4 sm:$0xff]   ;;  %v5299_v9 = vld [vmem:[#allocation5 + $0xf80] ss:$16 sps:$4 sm:$0xff]  }
 0x1ff   :  { %3476 = vmatpush1.bf16.msra.mxu0 %v5207_v10  ;;  %3804 = vmatpush1.bf16.msra.mxu1 %v5210_v12  ;;  %v5302_v10 = vld [vmem:[#allocation5 + $0xf88] ss:$16 sps:$4 sm:$0xff]   ;;  %v5307_v12 = vld [vmem:[#allocation5 + $0xfa4] ss:$16 sps:$4 sm:$0xff]  }
 0x200   :  { %3477 = vmatprep.subr.bf16.mxu0 %v5215_v13  ;;  %3805 = vmatprep.subr.bf16.mxu1 %v5218_v15  ;;  %v5310_v13 = vld [vmem:[#allocation5 + $0xfac] ss:$16 sps:$4 sm:$0xff]   ;;  %v5305_v15 = vld [vmem:[#allocation5 + $0xfa0] ss:$16 sps:$4 sm:$0xff]  }
 0x203   :  { %3478 = vmatpush1.bf16.msra.mxu0 %v5213_v16  ;;  %3806 = vmatpush1.bf16.msra.mxu1 %v5216_v18  ;;  %v5308_v16 = vld [vmem:[#allocation5 + $0xfa8] ss:$16 sps:$4 sm:$0xff]   ;;  %v5313_v18 = vld [vmem:[#allocation5 + $0xfc4] ss:$16 sps:$4 sm:$0xff]  }
 0x204   :  { %3479 = vmatprep.subr.bf16.mxu0 %v5221_v20  ;;  %3807 = vmatprep.subr.bf16.mxu1 %v5224_v11  ;;  %v5316_v20 = vld [vmem:[#allocation5 + $0xfcc] ss:$16 sps:$4 sm:$0xff]   ;;  %v5311_v11 = vld [vmem:[#allocation5 + $0xfc0] ss:$16 sps:$4 sm:$0xff]  }
 0x207   :  { %3480 = vmatpush1.bf16.msra.mxu0 %v5219_v21  ;;  %3808 = vmatpush1.bf16.msra.mxu1 %v5222_v22  ;;  %v5314_v21 = vld [vmem:[#allocation5 + $0xfc8] ss:$16 sps:$4 sm:$0xff]   ;;  %v5319_v22 = vld [vmem:[#allocation5 + $0xfe4] ss:$16 sps:$4 sm:$0xff]  }
 0x208   :  { %3490 = vmatprep.subr.bf16.mxu0 %v5229_v23  ;;  %3818 = vmatprep.subr.bf16.mxu1 %v5232_v24  ;;  %v5322_v23 = vld [vmem:[#allocation5 + $0xfec] ss:$16 sps:$4 sm:$0xff]   ;;  %v5317_v24 = vld [vmem:[#allocation5 + $0xfe0] ss:$16 sps:$4 sm:$0xff]  }
 0x20a   :  { %3482 = vmatmul.mubr.bf16.vlgmr.msra.gmra.mrb[0].mxu0 %v3958_v25  ;;  %3810 = vmatmul.mubr.bf16.vlgmr.msra.gmra.mrb[0].mxu1 %v3958_v25  ;;  %v5320_v25 = vld [vmem:[#allocation5 + $0xfe8] ss:$16 sps:$4 sm:$0xff]  }
 0x20b   :  { %3491 = vmatpush1.bf16.msra.mxu0 %v5227_v26  ;;  %3819 = vmatpush1.bf16.msra.mxu1 %v5230_v27  ;;  %v3960_v26 = vcombine.low %v5559_v17, %v5559_v17  ;;  %v3861_v27 = vlaneseq }
 0x20c   :  { %3492 = vmatprep.subr.bf16.mxu0 %v5235_v28  ;;  %3820 = vmatprep.subr.bf16.mxu1 %v5238_v19 }
 0x20d   :  { %3522 = vmatprep.mubr.bf16.mxu0 %v3961_v29  ;;  %3850 = vmatprep.mubr.bf16.mxu1 %v3961_v29  ;;  %v3862_v28 = vshrl.u32 %v3861_v27, 7 }
 0x20f   :  { %3493 = vmatpush1.bf16.msra.mxu0 %v5233_v30  ;;  %3821 = vmatpush1.bf16.msra.mxu1 %v5236_v31  ;;  %v3863_v19 = vsub.s32 0, %v3862_v28  ;;  %v3871_v29 = vsub.s32 2, %v3862_v28  ;;  %v3859_v30 = vld [vmem:[#allocation7] sm:$0xf]  ;;  %v3867_v31 = vsub.s32 1, %v3862_v28 }
 0x210   :  { %3494 = vmatprep.subr.bf16.mxu0 %v5241_v14  ;;  %3822 = vmatprep.subr.bf16.mxu1 %v5244_v32  ;;  %v3875_v14 = vsub.s32 3, %v3862_v28  ;;  %v3885_v32 = vld [vmem:[#allocation8] sm:$0xf] }
 0x213   :  { %3495 = vmatpush1.bf16.msra.mxu0 %v5239_v33  ;;  %3823 = vmatpush1.bf16.msra.mxu1 %v5242_v34  ;;  %v3864_v33 = vrot.slane %v3859_v30, %v3863_v19  ;;  %v3872_v34 = vrot.slane %v3859_v30, %v3871_v29 }
 0x214   :  { %3496 = vmatprep.subr.bf16.mxu0 %v5247_v35  ;;  %3824 = vmatprep.subr.bf16.mxu1 %v5250_v36  ;;  %v3868_v35 = vrot.slane %v3859_v30, %v3867_v31  ;;  %v3876_v36 = vrot.slane %v3859_v30, %v3875_v14 }
 0x217   :  { %3497 = vmatpush1.bf16.msra.mxu0 %v5245_v37  ;;  %3825 = vmatpush1.bf16.msra.mxu1 %v5248_v38  ;;  %v3890_v37 = vrot.slane %v3885_v32, %v3863_v19  ;;  %v3898_v38 = vrot.slane %v3885_v32, %v3871_v29 }
 0x218   :  { %3498 = vmatprep.subr.bf16.mxu0 %v5253_v39  ;;  %3826 = vmatprep.subr.bf16.mxu1 %v5256_v40  ;;  %v3894_v40 = vrot.slane %v3885_v32, %v3867_v31 }
 0x21b   :  { %3499 = vmatpush1.bf16.msra.mxu0 %v5251_v41  ;;  %3827 = vmatpush1.bf16.msra.mxu1 %v5254_v42  ;;  %v3902_v41 = vrot.slane %v3885_v32, %v3875_v14 }
 0x21c   :  { %3500 = vmatprep.subr.bf16.mxu0 %v5259_v43  ;;  %3828 = vmatprep.subr.bf16.mxu1 %v5262_v44 }
 0x21f   :  { %3501 = vmatpush1.bf16.msra.mxu0 %v5257_v45  ;;  %3829 = vmatpush1.bf16.msra.mxu1 %v5260_v46 }
 0x220   :  { %3502 = vmatprep.subr.bf16.mxu0 %v5265_v47  ;;  %3830 = vmatprep.subr.bf16.mxu1 %v5268_v48 }
 0x223   :  { %3503 = vmatpush1.bf16.msra.mxu0 %v5263_v49  ;;  %3831 = vmatpush1.bf16.msra.mxu1 %v5266_v50 }
 0x224   :  { %3504 = vmatprep.subr.bf16.mxu0 %v5271_v51  ;;  %3832 = vmatprep.subr.bf16.mxu1 %v5274_v52 }
 0x227   :  { %3505 = vmatpush1.bf16.msra.mxu0 %v5269_v53  ;;  %3833 = vmatpush1.bf16.msra.mxu1 %v5272_v54 }
 0x228   :  { %3506 = vmatprep.subr.bf16.mxu0 %v5277_v55  ;;  %3834 = vmatprep.subr.bf16.mxu1 %v5280_v56 }
 0x22b   :  { %3507 = vmatpush1.bf16.msra.mxu0 %v5275_v57  ;;  %3835 = vmatpush1.bf16.msra.mxu1 %v5278_v58 }
 0x22c   :  { %3508 = vmatprep.subr.bf16.mxu0 %v5283_v59  ;;  %3836 = vmatprep.subr.bf16.mxu1 %v5286_v60 }
 0x22f   :  { %3509 = vmatpush1.bf16.msra.mxu0 %v5281_v61  ;;  %3837 = vmatpush1.bf16.msra.mxu1 %v5284_v62 }
 0x230   :  { %3510 = vmatprep.subr.bf16.mxu0 %v5289_v63  ;;  %3838 = vmatprep.subr.bf16.mxu1 %v5292_v0 }
 0x233   :  { %3511 = vmatpush1.bf16.msra.mxu0 %v5287_v1  ;;  %3839 = vmatpush1.bf16.msra.mxu1 %v5290_v2 }
 0x234   :  { %3512 = vmatprep.subr.bf16.mxu0 %v5295_v3  ;;  %3840 = vmatprep.subr.bf16.mxu1 %v5298_v4 }
 0x237   :  { %3513 = vmatpush1.bf16.msra.mxu0 %v5293_v5  ;;  %3841 = vmatpush1.bf16.msra.mxu1 %v5296_v6 }
 0x238   :  { %3514 = vmatprep.subr.bf16.mxu0 %v5301_v7  ;;  %3842 = vmatprep.subr.bf16.mxu1 %v5304_v8 }
 0x23b   :  { %3515 = vmatpush1.bf16.msra.mxu0 %v5299_v9  ;;  %3843 = vmatpush1.bf16.msra.mxu1 %v5302_v10 }
 0x23c   :  { %3516 = vmatprep.subr.bf16.mxu0 %v5307_v12  ;;  %3844 = vmatprep.subr.bf16.mxu1 %v5310_v13 }
 0x23f   :  { %3517 = vmatpush1.bf16.msra.mxu0 %v5305_v15  ;;  %3845 = vmatpush1.bf16.msra.mxu1 %v5308_v16 }
 0x240   :  { %3518 = vmatprep.subr.bf16.mxu0 %v5313_v18  ;;  %3846 = vmatprep.subr.bf16.mxu1 %v5316_v20 }
 0x243   :  { %3519 = vmatpush1.bf16.msra.mxu0 %v5311_v11  ;;  %3847 = vmatpush1.bf16.msra.mxu1 %v5314_v21 }
 0x244   :  { %3520 = vmatprep.subr.bf16.mxu0 %v5319_v22  ;;  %3848 = vmatprep.subr.bf16.mxu1 %v5322_v23 }
 0x247   :  { %3521 = vmatpush1.bf16.msra.mxu0 %v5317_v24  ;;  %3849 = vmatpush1.bf16.msra.mxu1 %v5320_v25 }
 0x24a   :  { %3523 = vmatmul.mubr.bf16.vlgmr.msra.gmra.mrb[0].mxu0 %v3960_v26  ;;  %3851 = vmatmul.mubr.bf16.vlgmr.msra.gmra.mrb[0].mxu1 %v3960_v26 }
 0x31d   :  { %v3524_v39 = vpop.f32.mrb[0].mxu0  ;;  %v3852_v17 = vpop.f32.mrb[0].mxu1 }
 0x31e   :  { %v3881_v42 = vmul.f32 %v3864_v33, %v3524_v39  ;;  %v3883_v43 = vmul.f32 %v3872_v34, %v3852_v17  ;;  %v3526_v44 = vpop.f32.mrb[1].mxu0  ;;  %v3854_v45 = vpop.f32.mrb[1].mxu1 }
 0x31f   :  { %v3882_v46 = vmul.f32 %v3868_v35, %v3526_v44  ;;  %v3884_v47 = vmul.f32 %v3876_v36, %v3854_v45  ;;  %v3528_v48 = vpop.f32.mrb[2].mxu0  ;;  %v3856_v49 = vpop.f32.mrb[2].mxu1 }
 0x320   :  { %v3907_v50 = vadd.f32 %v3890_v37, %v3881_v42  ;;  %v3909_v51 = vadd.f32 %v3898_v38, %v3883_v43  ;;  %v3529_v52 = vpop.f32.mrb[3].mxu0  ;;  %v3857_v53 = vpop.f32.mrb[3].mxu1 }
 0x321   :  { %v3908_v54 = vadd.f32 %v3894_v40, %v3882_v46  ;;  %v3910_v55 = vadd.f32 %v3902_v41, %v3884_v47 }
 0x323   :  { %v4476_v56 = vpack.c.bf16 %v3908_v54, %v3907_v50  ;;  %v4477_v57 = vpack.c.bf16 %v3910_v55, %v3909_v51 }
 0x325   :  { %3927 = vst [vmem:[#allocation10] sm:$0xff] %v4476_v56  ;;  %3928 = vst [vmem:[#allocation10 + $0x8] sm:$0xff] %v4477_v57 }
 0x326   :  { %5424 = shalt.err (!%p5421_p8)
}
 0x327   :  { %s5425_s1 = scalar_lea.hbm %s5581_s4, 256 }
 0x328   :  { %p5426_p9 = scmp.ne.s32.totalorder %s5581_s4, %s5425_s1  ;;  %p5429_p10 = scmp.lt.u32.totalorder %s5425_s1, %s5581_s4 }
 0x32a   :  { %p5431_p11 = pnand %p5429_p10, %p5426_p9 }
 0x32c   :  { %5434 = shalt.err (!%p5431_p11)
}
 0x32d   :  { %3938 = dma.vmem_to_hbm [thread:$0]  %s3936_s10, 256, %s5581_s4, [#allocation4]  }
 0x32e   :  { %5441 = dma.done.wait [#allocation4], 256  }
 0x32f   :  { %5442 = vsyncadd [#allocation4], 4294967040 }
 0x330   :  { %3942 = vsyncpa [#allocation3], 1 }
 0x331   :  { %3943 = vsyncpa [#allocation6], 1 }
 0x332   :  { %3944 = vsyncpa [#allocation9], 1 }
 0x333   :  { %3945 = vsyncpa [#allocation4], 1 }

</bundles_post_ra>
